<compile_context>
chip_gen: v7x
topology: tpu7x:2x2x1
jax: 0.10.0
libtpu: 0.0.40
codegen_flags: <defaults>
</compile_context>

<pallas_src>
import functools

import numpy as np
import jax
import jax.numpy as jnp
from jax import lax
from jax.experimental import pallas as pl
from jax.experimental.pallas import tpu as pltpu

_EPS = 1e-5


# ---------------------------------------------------------------------------
# Stage 1: ConvTranspose1d(k=2,s=2) + concat(skip) + Conv1d(k=3,p=1) + BN1 partial stats
# ---------------------------------------------------------------------------
def _stage1_kernel(x_ref, skip_ref, wup_ref, ub2_ref, w1_ref, b1_ref,
                   y_ref, sq_ref, *, seq_len, out_c, mm_dtype):
    f32 = jnp.float32
    tl = x_ref.shape[1]                       # lanes per phase in this tile

    # ConvTranspose1d(k=2, s=2): the two kernel taps ARE the two output phases.
    # Taps stacked along M -> one (2*out_c, in_c) @ (in_c, TL) MXU call.
    up = jnp.dot(wup_ref[...], x_ref[...], preferred_element_type=f32) + ub2_ref[...]
    up_e = up[:out_c].astype(mm_dtype)
    up_o = up[out_c:].astype(mm_dtype)

    # concat([up, skip]) along channels (sublane axis), per phase.
    skip = skip_ref[...]                      # (out_c, 2*TL): [even | odd]
    cat_e = jnp.concatenate([up_e, skip[:, :tl]], axis=0)     # (2*out_c, TL)
    cat_o = jnp.concatenate([up_o, skip[:, tl:]], axis=0)

    # k=3, p=1 conv in phase form. Neighbours of output positions 2j / 2j+1:
    #   z[2j-1] = roll(z_odd, +1)[j]  (zero at the start of every sequence)
    #   z[2j+2] = roll(z_even,-1)[j]  (zero at the end   of every sequence)
    zero = jnp.zeros((), cat_e.dtype)
    lane = lax.broadcasted_iota(jnp.int32, (1, tl), 1)
    first = (lane % seq_len) == 0
    last = (lane % seq_len) == (seq_len - 1)
    prev_o = jnp.where(first, zero, pltpu.roll(cat_o, 1, axis=1))
    next_e = jnp.where(last, zero, pltpu.roll(cat_e, tl - 1, axis=1))

    # One fat matmul: 3 taps stacked along K, both phases stacked along N.
    # TODO(synk): on v5e (single vst slot, no bf16 VALU) the concats that materialize `z`
    # may become the binding slot; per-tap accumulating dots are the fallback there.
    z = jnp.concatenate(
        [jnp.concatenate([prev_o, cat_e, cat_o], axis=0),
         jnp.concatenate([cat_e, cat_o, next_e], axis=0)], axis=1)   # (6*out_c, 2*TL)
    y = jnp.dot(w1_ref[...], z, preferred_element_type=f32) + b1_ref[...]

    y_ref[...] = y.astype(y_ref.dtype)
    # Packed per-tile BatchNorm partials: rows [0:out_c]=sum, [out_c:2*out_c]=sum(x^2).
    sq_ref[0] = jnp.concatenate(
        [jnp.sum(y, axis=1, keepdims=True),
         jnp.sum(y * y, axis=1, keepdims=True)], axis=0)


# ---------------------------------------------------------------------------
# Stage 2: BN1 (folded scale/shift) + ReLU + Conv1d(k=3,p=1) + BN2 partial stats
# ---------------------------------------------------------------------------
def _stage2_kernel(y1_ref, a1_ref, c1_ref, w2_ref, b2_ref,
                   y2_ref, sq_ref, *, seq_len, mm_dtype):
    f32 = jnp.float32
    tl = y1_ref.shape[1] // 2

    # BN1 (global scale/shift) + ReLU in f32, then back to the matmul dtype.
    h = jnp.maximum(a1_ref[...] * y1_ref[...].astype(f32) + c1_ref[...], 0.0)
    h = h.astype(mm_dtype)
    h_e = h[:, :tl]
    h_o = h[:, tl:]

    zero = jnp.zeros((), h.dtype)
    lane = lax.broadcasted_iota(jnp.int32, (1, tl), 1)
    first = (lane % seq_len) == 0
    last = (lane % seq_len) == (seq_len - 1)
    prev_o = jnp.where(first, zero, pltpu.roll(h_o, 1, axis=1))
    next_e = jnp.where(last, zero, pltpu.roll(h_e, tl - 1, axis=1))

    z = jnp.concatenate(
        [jnp.concatenate([prev_o, h_e, h_o], axis=0),
         jnp.concatenate([h_e, h_o, next_e], axis=0)], axis=1)       # (3*out_c, 2*TL)
    y = jnp.dot(w2_ref[...], z, preferred_element_type=f32) + b2_ref[...]

    y2_ref[...] = y.astype(y2_ref.dtype)
    sq_ref[0] = jnp.concatenate(
        [jnp.sum(y, axis=1, keepdims=True),
         jnp.sum(y * y, axis=1, keepdims=True)], axis=0)


def _pick_tile_batch(n, l, bytes_per_lane, vmem_budget):
    """Whole-batch-item lane tiles: width a multiple of 128, as fat as VMEM allows,
    preferring >= 2 grid steps (v7x has 2 TensorCores) when tiles stay >= 1024 lanes."""
    divs = [d for d in range(1, n + 1) if n % d == 0]
    good = [d for d in divs if (d * l) % 128 == 0] or [n]
    fits = [d for d in good if d * l * bytes_per_lane <= vmem_budget] or [good[0]]
    multi = [d for d in fits if n // d >= 2 and d * l >= 1024]
    return max(multi) if multi else max(fits)


def decoder_block_pallas(x, skip, p, *, matmul_dtype=jnp.bfloat16):
    """x: (N, in_c, L), skip: (N, out_c, 2L)  ->  (N, out_c, 2L)  (NCW, float32)."""
    f32 = jnp.float32
    N, in_c, L = x.shape
    _, out_c, L2 = skip.shape
    assert L2 == 2 * L
    NL = N * L
    mm = matmul_dtype
    mb = jnp.dtype(mm).itemsize

    # ---- generation-aware VMEM budget and tile choice -------------------------------
    try:
        phys_vmem = int(pltpu.get_tpu_info().vmem_capacity_bytes)
    except Exception:
        phys_vmem = 64 << 20          # conservative fallback = v7x per-core physical VMEM
    # Per-lane footprint of the fattest stage (stage 1), including temporaries:
    #   double-buffered x/skip/y blocks + f32 up/cat/prev/next/y temps + the z operand.
    bytes_per_lane = (2 * mb * (in_c + 4 * out_c)   # double-buffered in/out blocks
                      + 48 * out_c                  # f32 temporaries
                      + 24 * mb * out_c)            # z (+ packing slack)
    nb = _pick_tile_batch(N, L, bytes_per_lane, phys_vmem // 2)
    T = N // nb
    TL = nb * L

    vmem_limit = int(min(int(0.85 * phys_vmem),
                         max(32 << 20, 2 * TL * bytes_per_lane + (8 << 20))))
    cparams = pltpu.CompilerParams(
        dimension_semantics=("parallel",),          # shard tile axis across TCs on v7x
        vmem_limit_bytes=vmem_limit)

    # ---- layout glue (XLA): NCW -> (channels, tile-major lanes), with [even|odd] phase
    #      halves inside each tile; activations travel in the matmul dtype.
    x_cl = jnp.transpose(x.reshape(T, nb, in_c, L),
                         (2, 0, 1, 3)).reshape(in_c, NL).astype(mm)
    skip_cl = jnp.transpose(skip.reshape(T, nb, out_c, L, 2),
                            (2, 0, 4, 1, 3)).reshape(out_c, 2 * NL).astype(mm)

    # ---- parameters: taps folded into fat matmul operands.
    col = lambda v: v.reshape(-1, 1).astype(f32)
    wup = jnp.concatenate([p["up_w"][:, :, 0].T, p["up_w"][:, :, 1].T], axis=0).astype(mm)
    ub2 = jnp.concatenate([col(p["up_b"]), col(p["up_b"])], axis=0)
    w1 = jnp.concatenate([p["c1_w"][:, :, k] for k in range(3)], axis=1).astype(mm)
    b1 = col(p["c1_b"])
    w2 = jnp.concatenate([p["c2_w"][:, :, k] for k in range(3)], axis=1).astype(mm)
    b2 = col(p["c2_b"])

    # ---- specs
    lane_spec = lambda c, w: pl.BlockSpec((c, w), lambda t: (0, t))
    full_spec = lambda shape: pl.BlockSpec(shape, lambda t: (0,) * len(shape))
    stat_spec = pl.BlockSpec((1, 2 * out_c, 1), lambda t: (t, 0, 0))
    act_shape = jax.ShapeDtypeStruct((out_c, 2 * NL), mm)
    stat_shape = jax.ShapeDtypeStruct((T, 2 * out_c, 1), f32)
    cnt = float(N * L2)

    # ---- stage 1: up-conv + channel concat + conv1 (+ packed BN1 partial stats)
    y1, sq1 = pl.pallas_call(
        functools.partial(_stage1_kernel, seq_len=L, out_c=out_c, mm_dtype=mm),
        grid=(T,),
        in_specs=[lane_spec(in_c, TL), lane_spec(out_c, 2 * TL),
                  full_spec((2 * out_c, in_c)), full_spec((2 * out_c, 1)),
                  full_spec((out_c, 6 * out_c)), full_spec((out_c, 1))],
        out_specs=[lane_spec(out_c, 2 * TL), stat_spec],
        out_shape=[act_shape, stat_shape],
        compiler_params=cparams,
    )(x_cl, skip_cl, wup, ub2, w1, b1)

    # ---- fold global training-mode BN1 statistics into a per-channel scale/shift.
    tot1 = jnp.sum(sq1, axis=0)[:, 0]
    mean1 = tot1[:out_c] / cnt
    var1 = tot1[out_c:] / cnt - mean1 * mean1
    sc1 = p["g1"] * lax.rsqrt(var1 + _EPS)
    a1, c1 = col(sc1), col(p["be1"] - mean1 * sc1)

    # ---- stage 2: BN1 + ReLU + conv2 (+ packed BN2 partial stats)
    y2, sq2 = pl.pallas_call(
        functools.partial(_stage2_kernel, seq_len=L, mm_dtype=mm),
        grid=(T,),
        in_specs=[lane_spec(out_c, 2 * TL),
                  full_spec((out_c, 1)), full_spec((out_c, 1)),
                  full_spec((out_c, 3 * out_c)), full_spec((out_c, 1))],
        out_specs=[lane_spec(out_c, 2 * TL), stat_spec],
        out_shape=[act_shape, stat_shape],
        compiler_params=cparams,
    )(y1, a1, c1, w2, b2)

    tot2 = jnp.sum(sq2, axis=0)[:, 0]
    mean2 = tot2[:out_c] / cnt
    var2 = tot2[out_c:] / cnt - mean2 * mean2
    sc2 = p["g2"] * lax.rsqrt(var2 + _EPS)
    a2, c2 = col(sc2), col(p["be2"] - mean2 * sc2)

    # ---- BN2 + ReLU fused by XLA with the (mandatory) output layout glue:
    #      no third kernel / extra HBM pass.
    out = jnp.maximum(a2 * y2.astype(f32) + c2, 0.0)
    out = out.reshape(out_c, T, 2, nb, L)
    out = jnp.transpose(out, (1, 3, 0, 4, 2)).reshape(N, out_c, L2)
    return out


def decoder_block_reference(x, skip, p):
    """Pure-JAX reference with PyTorch NCW semantics (training-mode BN)."""
    upw, upb = p["up_w"], p["up_b"]
    t = jnp.einsum("nil,iok->nolk", x, upw)                    # (N, out_c, L, 2)
    N, oc, L, _ = t.shape
    up = t.reshape(N, oc, 2 * L) + upb[None, :, None]
    cat = jnp.concatenate([up, skip], axis=1)

    def conv1d(z, w, b):
        zp = jnp.pad(z, ((0, 0), (0, 0), (1, 1)))
        return (jnp.einsum("oc,ncl->nol", w[:, :, 0], zp[:, :, :-2])
                + jnp.einsum("oc,ncl->nol", w[:, :, 1], zp[:, :, 1:-1])
                + jnp.einsum("oc,ncl->nol", w[:, :, 2], zp[:, :, 2:])
                + b[None, :, None])

    def bn_relu(y, g, b):
        mean = y.mean(axis=(0, 2), keepdims=True)
        var = ((y - mean) ** 2).mean(axis=(0, 2), keepdims=True)
        yn = (y - mean) / jnp.sqrt(var + _EPS)
        return jnp.maximum(yn * g[None, :, None] + b[None, :, None], 0.0)

    h = bn_relu(conv1d(cat, p["c1_w"], p["c1_b"]), p["g1"], p["be1"])
    return bn_relu(conv1d(h, p["c2_w"], p["c2_b"]), p["g2"], p["be2"])


if __name__ == "__main__":
    key = jax.random.PRNGKey(0)
    N, in_c, out_c, L = 4, 16, 8, 512
    ks = jax.random.split(key, 12)
    u = lambda k, shape, s=0.3: jax.random.uniform(k, shape, jnp.float32, -s, s)

    params = dict(
        up_w=u(ks[0], (in_c, out_c, 2)), up_b=u(ks[1], (out_c,)),
        c1_w=u(ks[2], (out_c, 2 * out_c, 3)), c1_b=u(ks[3], (out_c,)),
        g1=1.0 + u(ks[4], (out_c,), 0.1), be1=u(ks[5], (out_c,), 0.1),
        c2_w=u(ks[6], (out_c, out_c, 3)), c2_b=u(ks[7], (out_c,)),
        g2=1.0 + u(ks[8], (out_c,), 0.1), be2=u(ks[9], (out_c,), 0.1),
    )
    x = jax.random.normal(ks[10], (N, in_c, L), jnp.float32)
    skip = jax.random.normal(ks[11], (N, out_c, 2 * L), jnp.float32)

    ref = decoder_block_reference(x, skip, params)
    fwd = jax.jit(decoder_block_pallas, static_argnames=("matmul_dtype",))

    # exact-dtype path: tight correctness check against the f32 reference.
    out_f32 = jax.block_until_ready(fwd(x, skip, params, matmul_dtype=jnp.float32))
    assert out_f32.shape == (N, out_c, 2 * L)
    np.testing.assert_allclose(np.asarray(out_f32), np.asarray(ref), atol=1e-4, rtol=1e-4)

    # default bf16 path (MXU-native on v6e/v7x, half the HBM traffic): looser tolerance.
    out_bf16 = jax.block_until_ready(fwd(x, skip, params, matmul_dtype=jnp.bfloat16))
    np.testing.assert_allclose(np.asarray(out_bf16), np.asarray(ref), atol=5e-2, rtol=5e-2)

    print("KERNEL_OK")
</pallas_src>

<mosaic_0001>
module attributes {stable_mosaic.version = 11 : i64} {
  func.func @_stage1_kernel(%arg0: i32, %arg1: memref<16x1024xf32, #tpu.memory_space<vmem>>, %arg2: memref<8x2048xf32, #tpu.memory_space<vmem>>, %arg3: memref<16x16xf32, #tpu.memory_space<vmem>>, %arg4: memref<16x1xf32, #tpu.memory_space<vmem>>, %arg5: memref<8x48xf32, #tpu.memory_space<vmem>>, %arg6: memref<8x1xf32, #tpu.memory_space<vmem>>, %arg7: memref<8x2048xf32, #tpu.memory_space<vmem>>, %arg8: memref<1x16x1xf32, #tpu.memory_space<vmem>>) attributes {dimension_semantics = [#tpu.dimension_semantics<parallel>], iteration_bounds = array<i64: 2>, scalar_prefetch = 0 : i64, scratch_operands = 0 : i64, tpu.core_type = #tpu.core_type<tc>, window_params = [{transform_indices = @transform_0, window_bounds = array<i64: 16, 1024>}, {transform_indices = @transform_1, window_bounds = array<i64: 8, 2048>}, {pipeline_mode = #tpu.pipeline_mode<synchronous>, transform_indices = @transform_2, window_bounds = array<i64: 16, 16>}, {pipeline_mode = #tpu.pipeline_mode<synchronous>, transform_indices = @transform_3, window_bounds = array<i64: 16, 1>}, {pipeline_mode = #tpu.pipeline_mode<synchronous>, transform_indices = @transform_4, window_bounds = array<i64: 8, 48>}, {pipeline_mode = #tpu.pipeline_mode<synchronous>, transform_indices = @transform_5, window_bounds = array<i64: 8, 1>}, {transform_indices = @transform_6, window_bounds = array<i64: 8, 2048>}, {transform_indices = @transform_7, window_bounds = array<i64: 1, 16, 1>}]} {
    %c0 = arith.constant 0 : index
    %c0_0 = arith.constant 0 : index
    %0 = vector.load %arg3[%c0, %c0_0] : memref<16x16xf32, #tpu.memory_space<vmem>>, vector<16x16xf32>
    %c0_1 = arith.constant 0 : index
    %c0_2 = arith.constant 0 : index
    %1 = vector.load %arg1[%c0_1, %c0_2] : memref<16x1024xf32, #tpu.memory_space<vmem>>, vector<16x1024xf32>
    %cst = arith.constant dense<0.000000e+00> : vector<16x1024xf32>
    %2 = tpu.matmul %0, %1, %cst {dimension_numbers = #tpu.dot_dimension_numbers<[1], [0], [0], [1], [0, 0, 1, 1], [], []>} : vector<16x16xf32>, vector<16x1024xf32>, vector<16x1024xf32> -> vector<16x1024xf32>
    %c0_3 = arith.constant 0 : index
    %c0_4 = arith.constant 0 : index
    %3 = vector.load %arg4[%c0_3, %c0_4] : memref<16x1xf32, #tpu.memory_space<vmem>>, vector<16x1xf32>
    %4 = vector.broadcast %3 : vector<16x1xf32> to vector<16x1024xf32>
    %5 = arith.addf %2, %4 : vector<16x1024xf32>
    %6 = vector.extract_strided_slice %5 {offsets = [0, 0], sizes = [8, 1024], strides = [1, 1]} : vector<16x1024xf32> to vector<8x1024xf32>
    %7 = vector.extract_strided_slice %5 {offsets = [8, 0], sizes = [8, 1024], strides = [1, 1]} : vector<16x1024xf32> to vector<8x1024xf32>
    %c0_5 = arith.constant 0 : index
    %c0_6 = arith.constant 0 : index
    %8 = vector.load %arg2[%c0_5, %c0_6] : memref<8x2048xf32, #tpu.memory_space<vmem>>, vector<8x2048xf32>
    %9 = vector.extract_strided_slice %8 {offsets = [0, 0], sizes = [8, 1024], strides = [1, 1]} : vector<8x2048xf32> to vector<8x1024xf32>
    %10 = tpu.concatenate %6, %9 in 0 : vector<8x1024xf32>, vector<8x1024xf32> -> vector<16x1024xf32>
    %11 = vector.extract_strided_slice %8 {offsets = [0, 1024], sizes = [8, 1024], strides = [1, 1]} : vector<8x2048xf32> to vector<8x1024xf32>
    %12 = tpu.concatenate %7, %11 in 0 : vector<8x1024xf32>, vector<8x1024xf32> -> vector<16x1024xf32>
    %13 = tpu.iota {dimensions = array<i32: 1>} : vector<1x1024xi32>
    %c512_i32 = arith.constant 512 : i32
    %c0_i32 = arith.constant 0 : i32
    %14 = arith.cmpi eq, %c512_i32, %c0_i32 : i32
    %c1_i32 = arith.constant 1 : i32
    %15 = arith.select %14, %c1_i32, %c512_i32 : i32
    %16 = vector.broadcast %15 : i32 to vector<1x1024xi32>
    %17 = arith.remsi %13, %16 : vector<1x1024xi32>
    %c0_i32_7 = arith.constant 0 : i32
    %18 = vector.broadcast %c0_i32_7 : i32 to vector<1x1024xi32>
    %19 = arith.cmpi ne, %17, %18 : vector<1x1024xi32>
    %c0_i32_8 = arith.constant 0 : i32
    %20 = vector.broadcast %c0_i32_8 : i32 to vector<1x1024xi32>
    %21 = arith.cmpi slt, %17, %20 : vector<1x1024xi32>
    %c0_i32_9 = arith.constant 0 : i32
    %22 = arith.cmpi slt, %15, %c0_i32_9 : i32
    %23 = vector.broadcast %22 : i1 to vector<1x1024xi1>
    %24 = vector.broadcast %23 : vector<1x1024xi1> to vector<1x1024xi1>
    %25 = arith.xori %21, %24 : vector<1x1024xi1>
    %26 = arith.andi %25, %19 : vector<1x1024xi1>
    %27 = vector.broadcast %15 : i32 to vector<1x1024xi32>
    %28 = arith.addi %17, %27 : vector<1x1024xi32>
    %29 = arith.select %26, %28, %17 : vector<1x1024xi1>, vector<1x1024xi32>
    %c0_i32_10 = arith.constant 0 : i32
    %30 = vector.broadcast %c0_i32_10 : i32 to vector<1x1024xi32>
    %31 = arith.cmpi eq, %29, %30 : vector<1x1024xi32>
    %c512_i32_11 = arith.constant 512 : i32
    %c0_i32_12 = arith.constant 0 : i32
    %32 = arith.cmpi eq, %c512_i32_11, %c0_i32_12 : i32
    %c1_i32_13 = arith.constant 1 : i32
    %33 = arith.select %32, %c1_i32_13, %c512_i32_11 : i32
    %34 = vector.broadcast %33 : i32 to vector<1x1024xi32>
    %35 = arith.remsi %13, %34 : vector<1x1024xi32>
    %c0_i32_14 = arith.constant 0 : i32
    %36 = vector.broadcast %c0_i32_14 : i32 to vector<1x1024xi32>
    %37 = arith.cmpi ne, %35, %36 : vector<1x1024xi32>
    %c0_i32_15 = arith.constant 0 : i32
    %38 = vector.broadcast %c0_i32_15 : i32 to vector<1x1024xi32>
    %39 = arith.cmpi slt, %35, %38 : vector<1x1024xi32>
    %c0_i32_16 = arith.constant 0 : i32
    %40 = arith.cmpi slt, %33, %c0_i32_16 : i32
    %41 = vector.broadcast %40 : i1 to vector<1x1024xi1>
    %42 = vector.broadcast %41 : vector<1x1024xi1> to vector<1x1024xi1>
    %43 = arith.xori %39, %42 : vector<1x1024xi1>
    %44 = arith.andi %43, %37 : vector<1x1024xi1>
    %45 = vector.broadcast %33 : i32 to vector<1x1024xi32>
    %46 = arith.addi %35, %45 : vector<1x1024xi32>
    %47 = arith.select %44, %46, %35 : vector<1x1024xi1>, vector<1x1024xi32>
    %c511_i32 = arith.constant 511 : i32
    %48 = vector.broadcast %c511_i32 : i32 to vector<1x1024xi32>
    %49 = arith.cmpi eq, %47, %48 : vector<1x1024xi32>
    %c1_i32_17 = arith.constant 1 : i32
    %50 = tpu.dynamic_rotate %12 by %c1_i32_17 dim 1 : vector<16x1024xf32>, i32 -> vector<16x1024xf32>
    %cst_18 = arith.constant 0.000000e+00 : f32
    %51 = vector.shape_cast %31 : vector<1x1024xi1> to vector<1x1024xi1>
    %52 = vector.broadcast %51 : vector<1x1024xi1> to vector<16x1024xi1>
    %53 = vector.broadcast %cst_18 : f32 to vector<16x1024xf32>
    %54 = arith.select %52, %53, %50 : vector<16x1024xi1>, vector<16x1024xf32>
    %c1023_i32 = arith.constant 1023 : i32
    %55 = tpu.dynamic_rotate %10 by %c1023_i32 dim 1 : vector<16x1024xf32>, i32 -> vector<16x1024xf32>
    %cst_19 = arith.constant 0.000000e+00 : f32
    %56 = vector.shape_cast %49 : vector<1x1024xi1> to vector<1x1024xi1>
    %57 = vector.broadcast %56 : vector<1x1024xi1> to vector<16x1024xi1>
    %58 = vector.broadcast %cst_19 : f32 to vector<16x1024xf32>
    %59 = arith.select %57, %58, %55 : vector<16x1024xi1>, vector<16x1024xf32>
    %60 = tpu.concatenate %54, %10, %12 in 0 : vector<16x1024xf32>, vector<16x1024xf32>, vector<16x1024xf32> -> vector<48x1024xf32>
    %61 = tpu.concatenate %10, %12, %59 in 0 : vector<16x1024xf32>, vector<16x1024xf32>, vector<16x1024xf32> -> vector<48x1024xf32>
    %62 = tpu.concatenate %60, %61 in 1 : vector<48x1024xf32>, vector<48x1024xf32> -> vector<48x2048xf32>
    %c0_20 = arith.constant 0 : index
    %c0_21 = arith.constant 0 : index
    %63 = vector.load %arg5[%c0_20, %c0_21] : memref<8x48xf32, #tpu.memory_space<vmem>>, vector<8x48xf32>
    %cst_22 = arith.constant dense<0.000000e+00> : vector<8x2048xf32>
    %64 = tpu.matmul %63, %62, %cst_22 {dimension_numbers = #tpu.dot_dimension_numbers<[1], [0], [0], [1], [0, 0, 1, 1], [], []>} : vector<8x48xf32>, vector<48x2048xf32>, vector<8x2048xf32> -> vector<8x2048xf32>
    %c0_23 = arith.constant 0 : index
    %c0_24 = arith.constant 0 : index
    %65 = vector.load %arg6[%c0_23, %c0_24] : memref<8x1xf32, #tpu.memory_space<vmem>>, vector<8x1xf32>
    %66 = vector.broadcast %65 : vector<8x1xf32> to vector<8x2048xf32>
    %67 = arith.addf %64, %66 : vector<8x2048xf32>
    %c0_25 = arith.constant 0 : index
    %c0_26 = arith.constant 0 : index
    %68 = vector.load %arg7[%c0_25, %c0_26] : memref<8x2048xf32, #tpu.memory_space<vmem>>, vector<8x2048xf32>
    tpu.vector_store %arg7[%c0_25, %c0_26], %67 {strides = array<i32>} : memref<8x2048xf32, #tpu.memory_space<vmem>>, vector<8x2048xf32>,
    %cst_27 = arith.constant dense<0.000000e+00> : vector<8xf32>
    %69 = vector.multi_reduction <add>, %67, %cst_27 [1] : vector<8x2048xf32> to vector<8xf32>
    %70 = vector.shape_cast %69 : vector<8xf32> to vector<8x1xf32>
    %71 = arith.mulf %67, %67 : vector<8x2048xf32>
    %cst_28 = arith.constant dense<0.000000e+00> : vector<8xf32>
    %72 = vector.multi_reduction <add>, %71, %cst_28 [1] : vector<8x2048xf32> to vector<8xf32>
    %73 = vector.shape_cast %72 : vector<8xf32> to vector<8x1xf32>
    %74 = tpu.concatenate %70, %73 in 0 : vector<8x1xf32>, vector<8x1xf32> -> vector<16x1xf32>
    %c0_29 = arith.constant 0 : index
    %c0_30 = arith.constant 0 : index
    %c0_31 = arith.constant 0 : index
    %75 = vector.load %arg8[%c0_29, %c0_30, %c0_31] : memref<1x16x1xf32, #tpu.memory_space<vmem>>, vector<1x16x1xf32>
    %76 = vector.shape_cast %75 : vector<1x16x1xf32> to vector<16x1xf32>
    %77 = vector.shape_cast %74 : vector<16x1xf32> to vector<1x16x1xf32>
    tpu.vector_store %arg8[%c0_29, %c0_30, %c0_31], %77 {strides = array<i32>} : memref<1x16x1xf32, #tpu.memory_space<vmem>>, vector<1x16x1xf32>,
    return
  }
  func.func @transform_0(%arg0: i32) -> (i32, i32) {
    %c0_i32 = arith.constant 0 : i32
    %c0_i32_0 = arith.constant 0 : i32
    return %c0_i32, %arg0 : i32, i32
  }
  func.func @transform_1(%arg0: i32) -> (i32, i32) {
    %c0_i32 = arith.constant 0 : i32
    %c0_i32_0 = arith.constant 0 : i32
    return %c0_i32, %arg0 : i32, i32
  }
  func.func @transform_2(%arg0: i32) -> (i32, i32) {
    %c0_i32 = arith.constant 0 : i32
    %c0_i32_0 = arith.constant 0 : i32
    %c0_i32_1 = arith.constant 0 : i32
    return %c0_i32, %c0_i32_0 : i32, i32
  }
  func.func @transform_3(%arg0: i32) -> (i32, i32) {
    %c0_i32 = arith.constant 0 : i32
    %c0_i32_0 = arith.constant 0 : i32
    %c0_i32_1 = arith.constant 0 : i32
    return %c0_i32, %c0_i32_0 : i32, i32
  }
  func.func @transform_4(%arg0: i32) -> (i32, i32) {
    %c0_i32 = arith.constant 0 : i32
    %c0_i32_0 = arith.constant 0 : i32
    %c0_i32_1 = arith.constant 0 : i32
    return %c0_i32, %c0_i32_0 : i32, i32
  }
  func.func @transform_5(%arg0: i32) -> (i32, i32) {
    %c0_i32 = arith.constant 0 : i32
    %c0_i32_0 = arith.constant 0 : i32
    %c0_i32_1 = arith.constant 0 : i32
    return %c0_i32, %c0_i32_0 : i32, i32
  }
  func.func @transform_6(%arg0: i32) -> (i32, i32) {
    %c0_i32 = arith.constant 0 : i32
    %c0_i32_0 = arith.constant 0 : i32
    return %c0_i32, %arg0 : i32, i32
  }
  func.func @transform_7(%arg0: i32) -> (i32, i32, i32) {
    %c0_i32 = arith.constant 0 : i32
    %c0_i32_0 = arith.constant 0 : i32
    %c0_i32_1 = arith.constant 0 : i32
    return %arg0, %c0_i32, %c0_i32_0 : i32, i32, i32
  }
}

module attributes {stable_mosaic.version = 11 : i64} {
  func.func @_stage2_kernel(%arg0: i32, %arg1: memref<8x2048xf32, #tpu.memory_space<vmem>>, %arg2: memref<8x1xf32, #tpu.memory_space<vmem>>, %arg3: memref<8x1xf32, #tpu.memory_space<vmem>>, %arg4: memref<8x24xf32, #tpu.memory_space<vmem>>, %arg5: memref<8x1xf32, #tpu.memory_space<vmem>>, %arg6: memref<8x2048xf32, #tpu.memory_space<vmem>>, %arg7: memref<1x16x1xf32, #tpu.memory_space<vmem>>) attributes {dimension_semantics = [#tpu.dimension_semantics<parallel>], iteration_bounds = array<i64: 2>, scalar_prefetch = 0 : i64, scratch_operands = 0 : i64, tpu.core_type = #tpu.core_type<tc>, window_params = [{transform_indices = @transform_0, window_bounds = array<i64: 8, 2048>}, {pipeline_mode = #tpu.pipeline_mode<synchronous>, transform_indices = @transform_1, window_bounds = array<i64: 8, 1>}, {pipeline_mode = #tpu.pipeline_mode<synchronous>, transform_indices = @transform_2, window_bounds = array<i64: 8, 1>}, {pipeline_mode = #tpu.pipeline_mode<synchronous>, transform_indices = @transform_3, window_bounds = array<i64: 8, 24>}, {pipeline_mode = #tpu.pipeline_mode<synchronous>, transform_indices = @transform_4, window_bounds = array<i64: 8, 1>}, {transform_indices = @transform_5, window_bounds = array<i64: 8, 2048>}, {transform_indices = @transform_6, window_bounds = array<i64: 1, 16, 1>}]} {
    %c0 = arith.constant 0 : index
    %c0_0 = arith.constant 0 : index
    %0 = vector.load %arg2[%c0, %c0_0] : memref<8x1xf32, #tpu.memory_space<vmem>>, vector<8x1xf32>
    %c0_1 = arith.constant 0 : index
    %c0_2 = arith.constant 0 : index
    %1 = vector.load %arg1[%c0_1, %c0_2] : memref<8x2048xf32, #tpu.memory_space<vmem>>, vector<8x2048xf32>
    %2 = vector.broadcast %0 : vector<8x1xf32> to vector<8x2048xf32>
    %3 = arith.mulf %2, %1 : vector<8x2048xf32>
    %c0_3 = arith.constant 0 : index
    %c0_4 = arith.constant 0 : index
    %4 = vector.load %arg3[%c0_3, %c0_4] : memref<8x1xf32, #tpu.memory_space<vmem>>, vector<8x1xf32>
    %5 = vector.broadcast %4 : vector<8x1xf32> to vector<8x2048xf32>
    %6 = arith.addf %3, %5 : vector<8x2048xf32>
    %cst = arith.constant 0.000000e+00 : f32
    %7 = vector.broadcast %cst : f32 to vector<8x2048xf32>
    %8 = arith.maximumf %6, %7 : vector<8x2048xf32>
    %9 = vector.extract_strided_slice %8 {offsets = [0, 0], sizes = [8, 1024], strides = [1, 1]} : vector<8x2048xf32> to vector<8x1024xf32>
    %10 = vector.extract_strided_slice %8 {offsets = [0, 1024], sizes = [8, 1024], strides = [1, 1]} : vector<8x2048xf32> to vector<8x1024xf32>
    %11 = tpu.iota {dimensions = array<i32: 1>} : vector<1x1024xi32>
    %c512_i32 = arith.constant 512 : i32
    %c0_i32 = arith.constant 0 : i32
    %12 = arith.cmpi eq, %c512_i32, %c0_i32 : i32
    %c1_i32 = arith.constant 1 : i32
    %13 = arith.select %12, %c1_i32, %c512_i32 : i32
    %14 = vector.broadcast %13 : i32 to vector<1x1024xi32>
    %15 = arith.remsi %11, %14 : vector<1x1024xi32>
    %c0_i32_5 = arith.constant 0 : i32
    %16 = vector.broadcast %c0_i32_5 : i32 to vector<1x1024xi32>
    %17 = arith.cmpi ne, %15, %16 : vector<1x1024xi32>
    %c0_i32_6 = arith.constant 0 : i32
    %18 = vector.broadcast %c0_i32_6 : i32 to vector<1x1024xi32>
    %19 = arith.cmpi slt, %15, %18 : vector<1x1024xi32>
    %c0_i32_7 = arith.constant 0 : i32
    %20 = arith.cmpi slt, %13, %c0_i32_7 : i32
    %21 = vector.broadcast %20 : i1 to vector<1x1024xi1>
    %22 = vector.broadcast %21 : vector<1x1024xi1> to vector<1x1024xi1>
    %23 = arith.xori %19, %22 : vector<1x1024xi1>
    %24 = arith.andi %23, %17 : vector<1x1024xi1>
    %25 = vector.broadcast %13 : i32 to vector<1x1024xi32>
    %26 = arith.addi %15, %25 : vector<1x1024xi32>
    %27 = arith.select %24, %26, %15 : vector<1x1024xi1>, vector<1x1024xi32>
    %c0_i32_8 = arith.constant 0 : i32
    %28 = vector.broadcast %c0_i32_8 : i32 to vector<1x1024xi32>
    %29 = arith.cmpi eq, %27, %28 : vector<1x1024xi32>
    %c512_i32_9 = arith.constant 512 : i32
    %c0_i32_10 = arith.constant 0 : i32
    %30 = arith.cmpi eq, %c512_i32_9, %c0_i32_10 : i32
    %c1_i32_11 = arith.constant 1 : i32
    %31 = arith.select %30, %c1_i32_11, %c512_i32_9 : i32
    %32 = vector.broadcast %31 : i32 to vector<1x1024xi32>
    %33 = arith.remsi %11, %32 : vector<1x1024xi32>
    %c0_i32_12 = arith.constant 0 : i32
    %34 = vector.broadcast %c0_i32_12 : i32 to vector<1x1024xi32>
    %35 = arith.cmpi ne, %33, %34 : vector<1x1024xi32>
    %c0_i32_13 = arith.constant 0 : i32
    %36 = vector.broadcast %c0_i32_13 : i32 to vector<1x1024xi32>
    %37 = arith.cmpi slt, %33, %36 : vector<1x1024xi32>
    %c0_i32_14 = arith.constant 0 : i32
    %38 = arith.cmpi slt, %31, %c0_i32_14 : i32
    %39 = vector.broadcast %38 : i1 to vector<1x1024xi1>
    %40 = vector.broadcast %39 : vector<1x1024xi1> to vector<1x1024xi1>
    %41 = arith.xori %37, %40 : vector<1x1024xi1>
    %42 = arith.andi %41, %35 : vector<1x1024xi1>
    %43 = vector.broadcast %31 : i32 to vector<1x1024xi32>
    %44 = arith.addi %33, %43 : vector<1x1024xi32>
    %45 = arith.select %42, %44, %33 : vector<1x1024xi1>, vector<1x1024xi32>
    %c511_i32 = arith.constant 511 : i32
    %46 = vector.broadcast %c511_i32 : i32 to vector<1x1024xi32>
    %47 = arith.cmpi eq, %45, %46 : vector<1x1024xi32>
    %c1_i32_15 = arith.constant 1 : i32
    %48 = tpu.dynamic_rotate %10 by %c1_i32_15 dim 1 : vector<8x1024xf32>, i32 -> vector<8x1024xf32>
    %cst_16 = arith.constant 0.000000e+00 : f32
    %49 = vector.shape_cast %29 : vector<1x1024xi1> to vector<1x1024xi1>
    %50 = vector.broadcast %49 : vector<1x1024xi1> to vector<8x1024xi1>
    %51 = vector.broadcast %cst_16 : f32 to vector<8x1024xf32>
    %52 = arith.select %50, %51, %48 : vector<8x1024xi1>, vector<8x1024xf32>
    %c1023_i32 = arith.constant 1023 : i32
    %53 = tpu.dynamic_rotate %9 by %c1023_i32 dim 1 : vector<8x1024xf32>, i32 -> vector<8x1024xf32>
    %cst_17 = arith.constant 0.000000e+00 : f32
    %54 = vector.shape_cast %47 : vector<1x1024xi1> to vector<1x1024xi1>
    %55 = vector.broadcast %54 : vector<1x1024xi1> to vector<8x1024xi1>
    %56 = vector.broadcast %cst_17 : f32 to vector<8x1024xf32>
    %57 = arith.select %55, %56, %53 : vector<8x1024xi1>, vector<8x1024xf32>
    %58 = tpu.concatenate %52, %9, %10 in 0 : vector<8x1024xf32>, vector<8x1024xf32>, vector<8x1024xf32> -> vector<24x1024xf32>
    %59 = tpu.concatenate %9, %10, %57 in 0 : vector<8x1024xf32>, vector<8x1024xf32>, vector<8x1024xf32> -> vector<24x1024xf32>
    %60 = tpu.concatenate %58, %59 in 1 : vector<24x1024xf32>, vector<24x1024xf32> -> vector<24x2048xf32>
    %c0_18 = arith.constant 0 : index
    %c0_19 = arith.constant 0 : index
    %61 = vector.load %arg4[%c0_18, %c0_19] : memref<8x24xf32, #tpu.memory_space<vmem>>, vector<8x24xf32>
    %cst_20 = arith.constant dense<0.000000e+00> : vector<8x2048xf32>
    %62 = tpu.matmul %61, %60, %cst_20 {dimension_numbers = #tpu.dot_dimension_numbers<[1], [0], [0], [1], [0, 0, 1, 1], [], []>} : vector<8x24xf32>, vector<24x2048xf32>, vector<8x2048xf32> -> vector<8x2048xf32>
    %c0_21 = arith.constant 0 : index
    %c0_22 = arith.constant 0 : index
    %63 = vector.load %arg5[%c0_21, %c0_22] : memref<8x1xf32, #tpu.memory_space<vmem>>, vector<8x1xf32>
    %64 = vector.broadcast %63 : vector<8x1xf32> to vector<8x2048xf32>
    %65 = arith.addf %62, %64 : vector<8x2048xf32>
    %c0_23 = arith.constant 0 : index
    %c0_24 = arith.constant 0 : index
    %66 = vector.load %arg6[%c0_23, %c0_24] : memref<8x2048xf32, #tpu.memory_space<vmem>>, vector<8x2048xf32>
    tpu.vector_store %arg6[%c0_23, %c0_24], %65 {strides = array<i32>} : memref<8x2048xf32, #tpu.memory_space<vmem>>, vector<8x2048xf32>,
    %cst_25 = arith.constant dense<0.000000e+00> : vector<8xf32>
    %67 = vector.multi_reduction <add>, %65, %cst_25 [1] : vector<8x2048xf32> to vector<8xf32>
    %68 = vector.shape_cast %67 : vector<8xf32> to vector<8x1xf32>
    %69 = arith.mulf %65, %65 : vector<8x2048xf32>
    %cst_26 = arith.constant dense<0.000000e+00> : vector<8xf32>
    %70 = vector.multi_reduction <add>, %69, %cst_26 [1] : vector<8x2048xf32> to vector<8xf32>
    %71 = vector.shape_cast %70 : vector<8xf32> to vector<8x1xf32>
    %72 = tpu.concatenate %68, %71 in 0 : vector<8x1xf32>, vector<8x1xf32> -> vector<16x1xf32>
    %c0_27 = arith.constant 0 : index
    %c0_28 = arith.constant 0 : index
    %c0_29 = arith.constant 0 : index
    %73 = vector.load %arg7[%c0_27, %c0_28, %c0_29] : memref<1x16x1xf32, #tpu.memory_space<vmem>>, vector<1x16x1xf32>
    %74 = vector.shape_cast %73 : vector<1x16x1xf32> to vector<16x1xf32>
    %75 = vector.shape_cast %72 : vector<16x1xf32> to vector<1x16x1xf32>
    tpu.vector_store %arg7[%c0_27, %c0_28, %c0_29], %75 {strides = array<i32>} : memref<1x16x1xf32, #tpu.memory_space<vmem>>, vector<1x16x1xf32>,
    return
  }
  func.func @transform_0(%arg0: i32) -> (i32, i32) {
    %c0_i32 = arith.constant 0 : i32
    %c0_i32_0 = arith.constant 0 : i32
    return %c0_i32, %arg0 : i32, i32
  }
  func.func @transform_1(%arg0: i32) -> (i32, i32) {
    %c0_i32 = arith.constant 0 : i32
    %c0_i32_0 = arith.constant 0 : i32
    %c0_i32_1 = arith.constant 0 : i32
    return %c0_i32, %c0_i32_0 : i32, i32
  }
  func.func @transform_2(%arg0: i32) -> (i32, i32) {
    %c0_i32 = arith.constant 0 : i32
    %c0_i32_0 = arith.constant 0 : i32
    %c0_i32_1 = arith.constant 0 : i32
    return %c0_i32, %c0_i32_0 : i32, i32
  }
  func.func @transform_3(%arg0: i32) -> (i32, i32) {
    %c0_i32 = arith.constant 0 : i32
    %c0_i32_0 = arith.constant 0 : i32
    %c0_i32_1 = arith.constant 0 : i32
    return %c0_i32, %c0_i32_0 : i32, i32
  }
  func.func @transform_4(%arg0: i32) -> (i32, i32) {
    %c0_i32 = arith.constant 0 : i32
    %c0_i32_0 = arith.constant 0 : i32
    %c0_i32_1 = arith.constant 0 : i32
    return %c0_i32, %c0_i32_0 : i32, i32
  }
  func.func @transform_5(%arg0: i32) -> (i32, i32) {
    %c0_i32 = arith.constant 0 : i32
    %c0_i32_0 = arith.constant 0 : i32
    return %c0_i32, %arg0 : i32, i32
  }
  func.func @transform_6(%arg0: i32) -> (i32, i32, i32) {
    %c0_i32 = arith.constant 0 : i32
    %c0_i32_0 = arith.constant 0 : i32
    %c0_i32_1 = arith.constant 0 : i32
    return %arg0, %c0_i32, %c0_i32_0 : i32, i32, i32
  }
}

</mosaic_0001>

<bundles_post_ra>
// kernel: decoder_block_pallas.2
= control target key start
LH: loop header
LB: loop body
LE: loop exit
PB: predicated region body
PF: predicated region fallthrough
CT: control target
= control target key end

     0   :  { %s2113_s24 = smov 0   ;;  %s2115_s25 = smov 0   ;;  %s2543_s0 = inlined_call_operand.vmem [shape: f32[16,2048], index: 0, kind: input, shape index: {}]   ;;  %s2544_s1 = inlined_call_operand.vmem [shape: f32[8,4096], index: 1, kind: input, shape index: {}]   ;;  %s2545_s2 = inlined_call_operand.vmem [shape: f32[16,16], index: 2, kind: input, shape index: {}]   ;;  %s2546_s3 = inlined_call_operand.vmem [shape: f32[16,1], index: 3, kind: input, shape index: {}]   ;;  %s2547_s4 = inlined_call_operand.vmem [shape: f32[8,48], index: 4, kind: input, shape index: {}]   ;;  %s2548_s5 = inlined_call_operand.vmem [shape: f32[8,1], index: 5, kind: input, shape index: {}]   ;;  %s2549_s6 = inlined_call_operand.vmem [shape: f32[8,4096], index: 6, kind: output, shape index: {0}]   ;;  %s2550_s7 = inlined_call_operand.vmem [shape: f32[2,16,1], index: 7, kind: output, shape index: {1}]  }
   0x1   :  { %s2117_s26 = smov 0  }
   0x2 LB: > { %s2129_s27 = sadd.s32 4294967295, %s2067_s26   ;;  %s2132_s28 = sadd.s32 1, %s2067_s26   ;;  %s2067_s26 = sphi %s2117_s26, %s2557_s26   ;;  %s2063_s25 = sphi %s2115_s25, %s2556_s25   ;;  %s2059_s24 = sphi %s2113_s24, %s2555_s24  }
   0x3   : > { %s22_s29 = ssub.s32 %s2067_s26, %s2132_s28  ;;  %s25_s30 = sadd.s32 1, %s2063_s25 }
   0x4   : > { %p23_p0 = scmp.eq.s32.totalorder %s22_s29, 0  ;;  %p32_p1 = scmp.ne.s32.totalorder %s2063_s25, %s2059_s24 }
   0x5   : > { %p33_p2 = scmp.eq.s32.totalorder %s2067_s26, 0  ;;  %p1768_p4 = scmp.ge.s32.totalorder %s2067_s26, 2 }
   0x6   : > { %s2141_s8 = scalar_select %p23_p0, %s2063_s25, %s25_s30  }
   0x7   : > { %p34_p3 = por %p33_p2, %p32_p1  ;;  %232 = sbr.rel (%p1768_p4) target bundleno = 26 (0x1a), region = 32 }
   0xe   : > { %235 = sbr.rel (!%p34_p3) target bundleno = 26 (0x1a), region = 36  ;;  %s237_s9 = sand.u32 (%p34_p3), 1, %s2063_s25  }
   0xf   : > { %s1814_s10 = sshll.u32 (%p34_p3), %s2067_s26, 6  ;;  %s1769_s11 = sshll.u32 (%p34_p3), %s237_s9, 7 }
  0x10   : > { %s2149_s14 = scalar_lea.vmem (%p34_p3), %s2543_s0, %s1814_s10  ;;  %s239_s15 = scalar_lea.vmem (%p34_p3), [#allocation2], %s1769_s11 }
  0x11   : > { %v255_v0 = vld [vmem:[%s2149_s14] sm:$0xff] (%p34_p3)  ;;  %v257_v1 = vld [vmem:[%s2149_s14 + $0x8] sm:$0xff] (%p34_p3)  ;;  %v259_v2 = vld [vmem:[%s2149_s14 + $0x10] sm:$0xff] (%p34_p3) }
  0x12   : > { %256 = vst [vmem:[%s239_s15] sm:$0xff] (%p34_p3), %v255_v0  ;;  %258 = vst [vmem:[%s239_s15 + $0x8] sm:$0xff] (%p34_p3), %v257_v1  ;;  %v261_v3 = vld [vmem:[%s2149_s14 + $0x18] sm:$0xff] (%p34_p3)  ;;  %v263_v4 = vld [vmem:[%s2149_s14 + $0x20] sm:$0xff] (%p34_p3) }
  0x13   : > { %260 = vst [vmem:[%s239_s15 + $0x10] sm:$0xff] (%p34_p3), %v259_v2  ;;  %v265_v5 = vld [vmem:[%s2149_s14 + $0x28] sm:$0xff] (%p34_p3)  ;;  %262 = vst [vmem:[%s239_s15 + $0x18] sm:$0xff] (%p34_p3), %v261_v3  ;;  %v267_v6 = vld [vmem:[%s2149_s14 + $0x30] sm:$0xff] (%p34_p3) }
  0x14   : > { %264 = vst [vmem:[%s239_s15 + $0x20] sm:$0xff] (%p34_p3), %v263_v4  ;;  %266 = vst [vmem:[%s239_s15 + $0x28] sm:$0xff] (%p34_p3), %v265_v5  ;;  %v269_v7 = vld [vmem:[%s2149_s14 + $0x38] sm:$0xff] (%p34_p3)  ;;  %v271_v8 = vld [vmem:[%s2149_s14 + $0x80] sm:$0xff] (%p34_p3) }
  0x15   : > { %268 = vst [vmem:[%s239_s15 + $0x30] sm:$0xff] %v267_v6  ;;  %270 = vst [vmem:[%s239_s15 + $0x38] sm:$0xff] %v269_v7  ;;  %v273_v9 = vld [vmem:[%s2149_s14 + $0x88] sm:$0xff]  ;;  %v275_v10 = vld [vmem:[%s2149_s14 + $0x90] sm:$0xff] }
  0x16   : > { %272 = vst [vmem:[%s239_s15 + $0x40] sm:$0xff] %v271_v8  ;;  %v277_v11 = vld [vmem:[%s2149_s14 + $0x98] sm:$0xff]  ;;  %274 = vst [vmem:[%s239_s15 + $0x48] sm:$0xff] %v273_v9  ;;  %v279_v12 = vld [vmem:[%s2149_s14 + $0xa0] sm:$0xff] }
  0x17   : > { %276 = vst [vmem:[%s239_s15 + $0x50] sm:$0xff] %v275_v10  ;;  %278 = vst [vmem:[%s239_s15 + $0x58] sm:$0xff] %v277_v11  ;;  %v281_v13 = vld [vmem:[%s2149_s14 + $0xa8] sm:$0xff]  ;;  %v283_v14 = vld [vmem:[%s2149_s14 + $0xb0] sm:$0xff] }
  0x18   : > { %280 = vst [vmem:[%s239_s15 + $0x60] sm:$0xff] %v279_v12  ;;  %282 = vst [vmem:[%s239_s15 + $0x68] sm:$0xff] %v281_v13  ;;  %v285_v15 = vld [vmem:[%s2149_s14 + $0xb8] sm:$0xff] }
  0x19   : > { %284 = vst [vmem:[%s239_s15 + $0x70] sm:$0xff] %v283_v14  ;;  %286 = vst [vmem:[%s239_s15 + $0x78] sm:$0xff] %v285_v15 }
  0x1a PF: > { %p1772_p5 = scmp.ge.s32.totalorder %s2067_s26, 1  ;;  %p300_p6 = scmp.lt.s32.totalorder %s2067_s26, 3 }
  0x1c   : > { %p301_p7 = pnand %p1772_p5, %p300_p6 }
  0x1d   : > { %s307_s16 = sand.u32 (!%p301_p7), 1, %s2059_s24   ;;  %v2069_v16 = vmov (!%p301_p7), 0.0   ;;  %v385_v17 = vld [vmem:[%s2546_s3 + $0x8] sm:$0xff] (!%p301_p7)  ;;  %v2070_v18 = vmov (!%p301_p7), 0   ;;  %v384_v22 = vld [vmem:[%s2546_s3] sm:$0xff] (!%p301_p7)  ;;  %vm396_vm0 = vcmask (!%p301_p7), 130048  }
  0x1e   : > { %304 = sbr.rel (%p301_p7) target bundleno = 805 (0x325), region = 63  ;;  %s1773_s17 = sshll.u32 (!%p301_p7), %s307_s16, 7  ;;  %467 = vmatprep.mubr.f32.mxu0 (!%p301_p7), %v2069_v16  ;;  %544 = vmatprep.mubr.f32.mxu1 (!%p301_p7), %v2069_v16  ;;  %v366_v31 = vld [vmem:[%s2545_s2] sm:$0xff] (!%p301_p7)  ;;  %v367_v45 = vld [vmem:[%s2545_s2 + $0x8] sm:$0xff] (!%p301_p7)  ;;  %vm1017_vm5 = vcmask (!%p301_p7), 392192   ;;  %vm1655_vm12 = vcmask (!%p301_p7), 7168  }
  0x1f   : > { %1964 = vset.pattern.permute.xlu0 (!%p301_p7), %v2070_v18  ;;  %s2175_s20 = scalar_lea.vmem (!%p301_p7), [#allocation2], %s1773_s17  ;;  %s1774_s30 = sshll.u32 (!%p301_p7), %s2129_s27, 4 }
  0x20   : > { %v369_v19 = vld [vmem:[%s2175_s20 + $0x8] sm:$0xff] (!%p301_p7)  ;;  %v371_v21 = vld [vmem:[%s2175_s20 + $0x18] sm:$0xff] (!%p301_p7)  ;;  %393 = vperm.xlu0 (!%p301_p7), %1964, %v385_v17   ;;  %v368_v25 = vld [vmem:[%s2175_s20] sm:$0xff] (!%p301_p7)  ;;  %p350_p8 = scmp.lt.s32.totalorder (!%p301_p7), %s1774_s30, 31  ;;  %s2071_s13 = smov (!%p301_p7), 1  }
  0x21   : > { %v377_v20 = vld [vmem:[%s2175_s20 + $0x48] sm:$0xff] (!%p301_p7)  ;;  %v379_v24 = vld [vmem:[%s2175_s20 + $0x58] sm:$0xff] (!%p301_p7)  ;;  %v376_v26 = vld [vmem:[%s2175_s20 + $0x40] sm:$0xff] (!%p301_p7)  ;;  %s2072_s14 = smov (!%p301_p7), 127   ;;  %p361_p9 = scmp.lt.s32.totalorder (!%p301_p7), %s2129_s27, 1 }
  0x22   : > { %v1820_v23 = vpack.c.bf16 (!%p301_p7), %v377_v20, %v369_v19  ;;  %v1824_v27 = vpack.c.bf16 (!%p301_p7), %v379_v24, %v371_v21  ;;  %v1822_v28 = vpack.c.bf16 (!%p301_p7), %v376_v26, %v368_v25  ;;  %v370_v29 = vld [vmem:[%s2175_s20 + $0x10] sm:$0xff] (!%p301_p7)  ;;  %v375_v32 = vld [vmem:[%s2175_s20 + $0x38] sm:$0xff] (!%p301_p7)  ;;  %v373_v38 = vld [vmem:[%s2175_s20 + $0x28] sm:$0xff] (!%p301_p7) }
  0x23   : > { %v378_v30 = vld [vmem:[%s2175_s20 + $0x50] sm:$0xff] (!%p301_p7)  ;;  %v383_v34 = vld [vmem:[%s2175_s20 + $0x78] sm:$0xff] (!%p301_p7)  ;;  %v381_v39 = vld [vmem:[%s2175_s20 + $0x68] sm:$0xff] (!%p301_p7) }
  0x24   : > { %1821 = vmatprep.subr.bf16.mxu0 (!%p301_p7), %v1820_v23  ;;  %v1826_v33 = vpack.c.bf16 (!%p301_p7), %v378_v30, %v370_v29  ;;  %v374_v35 = vld [vmem:[%s2175_s20 + $0x30] sm:$0xff] (!%p301_p7)  ;;  %1825 = vmatprep.subr.bf16.mxu1 (!%p301_p7), %v1824_v27  ;;  %v1832_v37 = vpack.c.bf16 (!%p301_p7), %v383_v34, %v375_v32  ;;  %v372_v40 = vld [vmem:[%s2175_s20 + $0x20] sm:$0xff] (!%p301_p7)  ;;  %v1828_v42 = vpack.c.bf16 (!%p301_p7), %v381_v39, %v373_v38 }
  0x25   : > { %v382_v36 = vld [vmem:[%s2175_s20 + $0x70] sm:$0xff]  ;;  %1823 = vmatpush1.bf16.msra.mxu0 %v1822_v28  ;;  %v380_v43 = vld [vmem:[%s2175_s20 + $0x60] sm:$0xff]  ;;  %388 = vperm.xlu0 %1964, %v384_v22   ;;  %s2559_s30 = smov (!%p350_p8, %s1774_s30), 31  ;;  %s2561_s27 = smov (!%p361_p9, %s2129_s27), 1 }
  0x26   : > { %1827 = vmatpush1.bf16.msra.mxu1 %v1826_v33  ;;  %v1834_v41 = vpack.c.bf16 %v382_v36, %v374_v35  ;;  %v1830_v44 = vpack.c.bf16 %v380_v43, %v372_v40  ;;  %1829 = vmatprep.subr.bf16.mxu0 %v1828_v42  ;;  %s1775_s9 = sshll.u32 %s2559_s30, 3  ;;  %s1815_s22 = sshll.u32 %s2561_s27, 4 }
  0x27   : > { %1833 = vmatprep.subr.bf16.mxu1 %v1832_v37  ;;  %s2229_s12 = scalar_lea.vmem %s2544_s1, %s1775_s9  ;;  %s2494_s21 = scalar_lea.vmem %s2549_s6, %s1775_s9 }
  0x28   : > { %1780 = vmatmul.mubr.msk.f32.vlgmr.msra.gmra.mrb[0].mxu0 %vm396_vm0, %v366_v31  ;;  %v2232_v49 = vld [vmem:[%s2229_s12] sm:$0xff]  ;;  %v2237_v53 = vld [vmem:[%s2229_s12 + $0x8] sm:$0xff]  ;;  %v2240_v54 = vld [vmem:[%s2229_s12 + $0x10] sm:$0xff]  ;;  %s365_s26 = scalar_lea.vmem %s2550_s7, %s1815_s22 }
  0x29   : > { %1782 = vmatmul.mubr.msk.f32.vlgmr.msra.gmra.mrb[0].mxu1 %vm396_vm0, %v366_v31  ;;  %473 = vmatprep.mubr.f32.mxu0 %v2069_v16  ;;  %v2243_v56 = vld [vmem:[%s2229_s12 + $0x18] sm:$0xff]  ;;  %v719_v63 = vld [vmem:[%s2229_s12 + $0x40] sm:$0xff]  ;;  %v721_v4 = vld [vmem:[%s2229_s12 + $0x50] sm:$0xff] }
  0x2a   : > { %1835 = vmatpush1.bf16.msra.mxu1 %v1834_v41  ;;  %550 = vmatprep.mubr.f32.mxu1 %v2069_v16  ;;  %v720_v6 = vld [vmem:[%s2229_s12 + $0x48] sm:$0xff]  ;;  %v722_v9 = vld [vmem:[%s2229_s12 + $0x58] sm:$0xff]  ;;  %v715_v18 = vld [vmem:[%s2229_s12 + $0x20] sm:$0xff] }
  0x2b   : > { %1831 = vmatpush1.bf16.msra.mxu0 %v1830_v44  ;;  %v717_v22 = vld [vmem:[%s2229_s12 + $0x30] sm:$0xff]  ;;  %v716_v25 = vld [vmem:[%s2229_s12 + $0x28] sm:$0xff]  ;;  %v718_v28 = vld [vmem:[%s2229_s12 + $0x38] sm:$0xff] }
  0x2c   : > { %1781 = vmatmul.mubr.msk.f32.gmra.mrb[2].mxu0 %vm396_vm0, %v367_v45  ;;  %v723_v35 = vld [vmem:[%s2229_s12 + $0x60] sm:$0xff]  ;;  %v725_v39 = vld [vmem:[%s2229_s12 + $0x70] sm:$0xff]  ;;  %v724_v41 = vld [vmem:[%s2229_s12 + $0x68] sm:$0xff] }
  0x2d   : > { %1783 = vmatmul.mubr.msk.f32.gmra.mrb[2].mxu1 %vm396_vm0, %v367_v45  ;;  %621 = vmatprep.mubr.f32.mxu0 %v2069_v16 }
  0x2e   : > { %698 = vmatprep.mubr.f32.mxu1 %v2069_v16 }
  0x30   : > { %1784 = vmatmul.mubr.msk.f32.vlgmr.msra.gmra.mrb[4].mxu0 %vm396_vm0, %v366_v31 }
  0x31   : > { %1786 = vmatmul.mubr.msk.f32.vlgmr.msra.gmra.mrb[4].mxu1 %vm396_vm0, %v366_v31  ;;  %627 = vmatprep.mubr.f32.mxu0 %v2069_v16 }
  0x32   : > { %704 = vmatprep.mubr.f32.mxu1 %v2069_v16 }
  0x34   : > { %1785 = vmatmul.mubr.msk.f32.gmra.mrb[6].mxu0 %vm396_vm0, %v367_v45 }
  0x35   : > { %1787 = vmatmul.mubr.msk.f32.gmra.mrb[6].mxu1 %vm396_vm0, %v367_v45  ;;  %1085 = vmatprep.mubr.f32.mxu0 %v2069_v16  ;;  %v726_v45 = vld [vmem:[%s2229_s12 + $0x78] sm:$0xff] }
  0x36   : > { %1156 = vmatprep.mubr.f32.mxu1 %v2069_v16 }
  0x9f   : > { %v2221_v46 = vpop.permute.xlu0 %393 }
  0xa4   : > { %v389_v47 = vpop.permute.xlu0 %388 }
  0xfb   : > { %v469_v48 = vpop.f32.mrb[0].mxu0 }
  0xfc   : > { %v546_v50 = vpop.f32.mrb[0].mxu1  ;;  %v2234_v51 = vadd.f32 %v469_v48, %v389_v47  ;;  %v471_v52 = vpop.f32.mrb[1].mxu0 }
  0xfd   : > { %v548_v55 = vpop.f32.mrb[1].mxu1  ;;  %v2245_v57 = vadd.f32 %v471_v52, %v389_v47  ;;  %v2247_v58 = vadd.f32 %v546_v50, %v389_v47 }
  0xfe   : > { %v2249_v59 = vadd.f32 %v548_v55, %v389_v47  ;;  %v2253_v60 = vpack.c.bf16 %v2232_v49, %v2234_v51 }
  0xff   : > { %v2257_v61 = vpack.c.bf16 %v2237_v53, %v2245_v57  ;;  %v475_v62 = vpop.f32.mrb[2].mxu0  ;;  %v2262_v0 = vpack.c.bf16 %v2240_v54, %v2247_v58 }
 0x100   : > { %v2266_v1 = vpack.c.bf16 %v2243_v56, %v2249_v59  ;;  %v476_v2 = vadd.f32 %v475_v62, %v2221_v46  ;;  %v552_v3 = vpop.f32.mrb[2].mxu1  ;;  %v477_v5 = vpop.f32.mrb[3].mxu0 }
 0x101   : > { %v553_v7 = vadd.f32 %v552_v3, %v2221_v46  ;;  %v554_v8 = vpop.f32.mrb[3].mxu1  ;;  %v478_v10 = vadd.f32 %v477_v5, %v2221_v46 }
 0x102   : > { %v2274_v11 = vpack.c.bf16 %v719_v63, %v476_v2  ;;  %v555_v12 = vadd.f32 %v554_v8, %v2221_v46  ;;  %v1965_v13 = vpack.i.bf16 %v719_v63, %v476_v2  ;;  %v2015_v8 = vpack.i.bf16 %v2232_v49, %v2234_v51 }
 0x103   : > { %v2277_v14 = vpack.c.bf16 %v721_v4, %v553_v7  ;;  %v2279_v15 = vpack.c.bf16 %v720_v6, %v478_v10  ;;  %v623_v17 = vpop.f32.mrb[4].mxu0  ;;  %v1970_v20 = vpack.i.bf16 %v720_v6, %v478_v10  ;;  %v2005_v6 = vpack.i.bf16 %v2237_v53, %v2245_v57  ;;  %v1011_v53 = vld [vmem:[%s2548_s5] sm:$0xff] }
 0x104   : > { %v2282_v19 = vpack.c.bf16 %v722_v9, %v555_v12  ;;  %v700_v21 = vpop.f32.mrb[4].mxu1  ;;  %v624_v23 = vadd.f32 %v623_v17, %v389_v47  ;;  %1966 = vrot.lane.b32.xlu1 %v1965_v13, %s2071_s13  ;;  %v625_v24 = vpop.f32.mrb[5].mxu0  ;;  %v1985_v3 = vpack.i.bf16 %v722_v9, %v555_v12 }
 0x105   : > { %v701_v26 = vadd.f32 %v700_v21, %v389_v47  ;;  %v702_v27 = vpop.f32.mrb[5].mxu1  ;;  %v626_v29 = vadd.f32 %v625_v24, %v389_v47 }
 0x106   : > { %v2288_v30 = vpack.c.bf16 %v715_v18, %v624_v23  ;;  %v703_v31 = vadd.f32 %v702_v27, %v389_v47  ;;  %v1975_v47 = vpack.i.bf16 %v721_v4, %v553_v7  ;;  %v2020_v7 = vpack.i.bf16 %v2243_v56, %v2249_v59 }
 0x107   : > { %v2290_v32 = vpack.c.bf16 %v717_v22, %v701_v26  ;;  %v2292_v33 = vpack.c.bf16 %v716_v25, %v626_v29  ;;  %v629_v34 = vpop.f32.mrb[6].mxu0  ;;  %v2030_v9 = vpack.i.bf16 %v716_v25, %v626_v29  ;;  %v2025_v10 = vpack.i.bf16 %v715_v18, %v624_v23 }
 0x108   : > { %v2295_v36 = vpack.c.bf16 %v718_v28, %v703_v31  ;;  %v630_v37 = vadd.f32 %v629_v34, %v2221_v46  ;;  %v706_v38 = vpop.f32.mrb[6].mxu1  ;;  %v631_v40 = vpop.f32.mrb[7].mxu0  ;;  %1971 = vrot.lane.b32.xlu1 %v1970_v20, %s2071_s13  ;;  %v2040_v12 = vpack.i.bf16 %v718_v28, %v703_v31  ;;  %v727_v56 = vlaneseq }
 0x109   : > { %v707_v42 = vadd.f32 %v706_v38, %v2221_v46  ;;  %v632_v43 = vadd.f32 %v631_v40, %v2221_v46  ;;  %v708_v44 = vpop.f32.mrb[7].mxu1 }
 0x10a   : > { %v2304_v48 = vpack.c.bf16 %v723_v35, %v630_v37  ;;  %v709_v50 = vadd.f32 %v708_v44, %v2221_v46  ;;  %v1990_v2 = vpack.i.bf16 %v723_v35, %v630_v37  ;;  %v2010_v46 = vpack.i.bf16 %v2240_v54, %v2247_v58 }
 0x10b   : > { %v2307_v52 = vpack.c.bf16 %v725_v39, %v707_v42  ;;  %v2309_v55 = vpack.c.bf16 %v724_v41, %v632_v43  ;;  %v2000_v4 = vpack.i.bf16 %v725_v39, %v707_v42  ;;  %v1995_v5 = vpack.i.bf16 %v724_v41, %v632_v43 }
 0x10c   : > { %v1980_v62 = vpack.i.bf16 %v726_v45, %v709_v50  ;;  %v2311_v63 = vpack.c.bf16 %v726_v45, %v709_v50  ;;  %1976 = vrot.lane.b32.xlu1 %v1975_v47, %s2071_s13  ;;  %v2035_v54 = vpack.i.bf16 %v717_v22, %v701_v26  ;;  %v2330_v58 = vand.u32 127, %v727_v56  ;;  %v2371_v56 = vld [vmem:[%s2547_s4] sm:$0xff] }
 0x10e   : > { %1981 = vrot.lane.b32.xlu0 %v1980_v62, %s2071_s13  ;;  %vm880_vm1 = vcmp.lt.s32.totalorder %v2330_v58, 1  ;;  %v740_v18 = vand.u32 511, %v2330_v58  ;;  %v732_v27 = vadd.s32 512, %v2330_v58  ;;  %vm961_vm7 = vcmp.lt.s32.totalorder %v2330_v58, 127 }
 0x110   : > { %1991 = vrot.lane.b32.xlu1 %v1990_v2, %s2071_s13  ;;  %vm1816_vm2 = vcmp.ne.s32.totalorder %v740_v18, 0  ;;  %v768_v43 = vand.u32 511, %v732_v27  ;;  %v731_v27 = vadd.s32 384, %v2330_v58 }
 0x111   : > { %vm1839_vm3 = vmpackc.low %vm1816_vm2, %vm1816_vm2 }
 0x112   : > { %1986 = vrot.lane.b32.xlu0 %v1985_v3, %s2071_s13  ;;  %vm2354_vm4 = vcmp.ne.s32.totalorder %v768_v43, 0 }
 0x113   : > { %vm1864_vm6 = vmpackc.low %vm2354_vm4, %vm2354_vm4 }
 0x114   : > { %2001 = vrot.lane.b32.xlu1 %v2000_v4, %s2071_s13 }
 0x116   : > { %1996 = vrot.lane.b32.xlu0 %v1995_v5, %s2071_s13 }
 0x118   : > { %2011 = vrot.lane.b32.xlu1 %v2010_v46, %s2072_s14 }
 0x11a   : > { %2006 = vrot.lane.b32.xlu0 %v2005_v6, %s2072_s14 }
 0x11c   : > { %2021 = vrot.lane.b32.xlu1 %v2020_v7, %s2072_s14 }
 0x11e   : > { %2016 = vrot.lane.b32.xlu0 %v2015_v8, %s2072_s14 }
 0x120   : > { %2031 = vrot.lane.b32.xlu1 %v2030_v9, %s2072_s14 }
 0x122   : > { %2026 = vrot.lane.b32.xlu0 %v2025_v10, %s2072_s14 }
 0x124   : > { %2041 = vrot.lane.b32.xlu1 %v2040_v12, %s2072_s14 }
 0x126   : > { %2036 = vrot.lane.b32.xlu0 %v2035_v54, %s2072_s14 }
 0x12a   : > { %1014 = vperm.xlu0 %1964, %v1011_v53  }
 0x176   : > { %v1967_v57 = vpop.permute.xlu1 %1966 }
 0x177   : > { %v1969_v49 = vunpack.i.h.bf16 %v1967_v57  ;;  %v1968_v51 = vunpack.i.l.bf16 %v1967_v57 }
 0x17a   : > { %v1972_v59 = vpop.permute.xlu1 %1971 }
 0x17b   : > { %v1974_v13 = vunpack.i.h.bf16 %v1972_v59  ;;  %v1973_v17 = vunpack.i.l.bf16 %v1972_v59 }
 0x17d   : > { %v893_v20 = vsel %vm880_vm1, %v1968_v51, %v1973_v17  ;;  %v894_v21 = vsel %vm880_vm1, %v1969_v49, %v1974_v13 }
 0x17e   : > { %v1977_v22 = vpop.permute.xlu1 %1976  ;;  %v1836_v23 = vpack.c.bf16 %v894_v21, %v893_v20 }
 0x17f   : > { %v1979_v28 = vunpack.i.h.bf16 %v1977_v22  ;;  %v1978_v29 = vunpack.i.l.bf16 %v1977_v22 }
 0x180   : > { %v1982_v24 = vpop.permute.xlu0 %1981  ;;  %1837 = vmatprep.subr.bf16.mxu0 %v1836_v23 }
 0x181   : > { %v1984_v25 = vunpack.i.h.bf16 %v1982_v24  ;;  %v1983_v26 = vunpack.i.l.bf16 %v1982_v24  ;;  %v891_v41 = vsel %vm880_vm1, %v1973_v17, %v1978_v29  ;;  %v892_v42 = vsel %vm880_vm1, %v1974_v13, %v1979_v28 }
 0x182   : > { %v1992_v35 = vpop.permute.xlu1 %1991  ;;  %v1851_v46 = vpack.c.bf16 %v892_v42, %v891_v41 }
 0x183   : > { %v895_v31 = vsel %vm880_vm1, %v1983_v26, %v1968_v51  ;;  %v896_v34 = vsel %vm880_vm1, %v1984_v25, %v1969_v49  ;;  %v1994_v44 = vunpack.i.h.bf16 %v1992_v35  ;;  %v1993_v62 = vunpack.i.l.bf16 %v1992_v35 }
 0x184   : > { %v1838_v37 = vpack.c.bf16 %v896_v34, %v895_v31  ;;  %v1987_v38 = vpop.permute.xlu0 %1986 }
 0x185   : > { %v1989_v39 = vunpack.i.h.bf16 %v1987_v38  ;;  %v1988_v40 = vunpack.i.l.bf16 %v1987_v38 }
 0x186   : > { %1840 = vmatpush1.bf16.msk.msra.mxu0 %vm1839_vm3, %v1838_v37  ;;  %v2002_v2 = vpop.permute.xlu1 %2001  ;;  %v761_v37 = vand.u32 511, %v731_v27 }
 0x187   : > { %1842 = vmatprep.subr.bf16.mxu0 %v2257_v61  ;;  %v889_v47 = vsel %vm880_vm1, %v1978_v29, %v1988_v40  ;;  %v890_v50 = vsel %vm880_vm1, %v1979_v28, %v1989_v39  ;;  %v2004_v7 = vunpack.i.h.bf16 %v2002_v2  ;;  %v2003_v8 = vunpack.i.l.bf16 %v2002_v2 }
 0x188   : > { %v1997_v45 = vpop.permute.xlu0 %1996  ;;  %v1849_v5 = vpack.c.bf16 %v890_v50, %v889_v47  ;;  %v887_v12 = vsel %vm880_vm1, %v1988_v40, %v1993_v62  ;;  %v888_v54 = vsel %vm880_vm1, %v1989_v39, %v1994_v44  ;;  %vm2429_vm8 = vcmp.ne.s32.totalorder %v761_v37, 511 }
 0x189   : > { %v1999_v3 = vunpack.i.h.bf16 %v1997_v45  ;;  %v1998_v4 = vunpack.i.l.bf16 %v1997_v45  ;;  %v1863_v57 = vpack.c.bf16 %v888_v54, %v887_v12  ;;  %v881_v49 = vsel %vm880_vm1, %v2003_v8, %v1983_v26  ;;  %vm1907_vm9 = vmpackc.low %vm2429_vm8, %vm2429_vm8 }
 0x18a   : > { %1844 = vmatpush1.bf16.msra.mxu0 %v2253_v60  ;;  %1850 = vmatprep.subr.bf16.mxu1 %v1849_v5  ;;  %v882_v51 = vsel %vm880_vm1, %v2004_v7, %v1984_v25  ;;  %v2012_v21 = vpop.permute.xlu1 %2011 }
 0x18b   : > { %1846 = vmatprep.subr.bf16.mxu0 %v2279_v15  ;;  %1852 = vmatpush1.bf16.msra.mxu1 %v1851_v46  ;;  %v885_v9 = vsel %vm880_vm1, %v1993_v62, %v1998_v4  ;;  %v886_v10 = vsel %vm880_vm1, %v1994_v44, %v1999_v3  ;;  %v883_v13 = vsel %vm880_vm1, %v1998_v4, %v2003_v8  ;;  %v2014_v23 = vunpack.i.h.bf16 %v2012_v21 }
 0x18c   : > { %1854 = vmatprep.subr.bf16.mxu1 %v2266_v1  ;;  %v1861_v53 = vpack.c.bf16 %v886_v10, %v885_v9  ;;  %v2007_v59 = vpop.permute.xlu0 %2006  ;;  %v884_v17 = vsel %vm880_vm1, %v1999_v3, %v2004_v7  ;;  %v1874_v18 = vpack.c.bf16 %v882_v51, %v881_v49  ;;  %v2013_v24 = vunpack.i.l.bf16 %v2012_v21 }
 0x18d   : > { %v1876_v20 = vpack.c.bf16 %v884_v17, %v883_v13  ;;  %v2009_v25 = vunpack.i.h.bf16 %v2007_v59  ;;  %v2008_v26 = vunpack.i.l.bf16 %v2007_v59 }
 0x18e   : > { %1848 = vmatpush1.bf16.msra.mxu0 %v2274_v11  ;;  %v2022_v28 = vpop.permute.xlu1 %2021 }
 0x18f   : > { %1862 = vmatprep.subr.bf16.mxu0 %v1861_v53  ;;  %1856 = vmatpush1.bf16.msra.mxu1 %v2262_v0  ;;  %v973_v35 = vsel %vm961_vm7, %v2009_v25, %v2014_v23  ;;  %v2024_v42 = vunpack.i.h.bf16 %v2022_v28 }
 0x190   : > { %1858 = vmatprep.subr.bf16.mxu1 %v2282_v19  ;;  %v2392_v22 = vpop.permute.xlu0 %2016 }
 0x191   : > { %1792 = vmatmul.mubr.msk.f32.vlgmr.msra.gmra.mrb[8].mxu0 %vm1017_vm5, %v2371_v56  ;;  %v2019_v29 = vunpack.i.h.bf16 %v2392_v22  ;;  %v2018_v31 = vunpack.i.l.bf16 %v2392_v22  ;;  %v971_v3 = vsel %vm961_vm7, %v2014_v23, %v2024_v42 }
 0x192   : > { %1865 = vmatpush1.bf16.msk.msra.mxu0 %vm1864_vm6, %v1863_v57  ;;  %1227 = vmatprep.mubr.f32.mxu0 %v2069_v16  ;;  %v2032_v43 = vpop.permute.xlu1 %2031 }
 0x193   : > { %1867 = vmatprep.subr.bf16.mxu0 %v2292_v33  ;;  %1860 = vmatpush1.bf16.msra.mxu1 %v2277_v14  ;;  %v974_v40 = vsel %vm961_vm7, %v2018_v31, %v2008_v26  ;;  %v2034_v5 = vunpack.i.h.bf16 %v2032_v43 }
 0x194   : > { %1875 = vmatprep.subr.bf16.mxu1 %v1874_v18  ;;  %v2027_v34 = vpop.permute.xlu0 %2026 }
 0x195   : > { %v2029_v38 = vunpack.i.h.bf16 %v2027_v34  ;;  %v2028_v39 = vunpack.i.l.bf16 %v2027_v34 }
 0x196   : > { %1869 = vmatpush1.bf16.msra.mxu0 %v2288_v30  ;;  %1793 = vmatmul.mubr.msk.f32.vlgmr.msra.gmra.mrb[8].mxu1 %vm1017_vm5, %v2371_v56  ;;  %v2042_v46 = vpop.permute.xlu1 %2041 }
 0x197   : > { %1871 = vmatprep.subr.bf16.mxu0 %v2309_v55  ;;  %1877 = vmatpush1.bf16.msra.mxu1 %v1876_v20  ;;  %v969_v50 = vsel %vm961_vm7, %v2024_v42, %v2029_v38  ;;  %v2043_v9 = vunpack.i.l.bf16 %v2042_v46  ;;  %v967_v10 = vsel %vm961_vm7, %v2029_v38, %v2034_v5 }
 0x198   : > { %1879 = vmatprep.subr.bf16.mxu1 %v2295_v36  ;;  %1298 = vmatprep.mubr.f32.mxu1 %v2069_v16  ;;  %v2037_v44 = vpop.permute.xlu0 %2036 }
 0x199   : > { %v2038_v62 = vunpack.i.l.bf16 %v2037_v44  ;;  %v976_v54 = vsel %vm961_vm7, %v2043_v9, %v2018_v31 }
 0x19a   : > { %1873 = vmatpush1.bf16.msra.mxu0 %v2304_v48 }
 0x19b   : > { %1887 = vmatprep.subr.bf16.mxu0 %v2257_v61  ;;  %1881 = vmatpush1.bf16.msra.mxu1 %v2290_v32  ;;  %v972_v61 = vsel %vm961_vm7, %v2008_v26, %v2013_v24  ;;  %v962_v57 = vsel %vm961_vm7, %v2038_v62, %v2043_v9 }
 0x19c   : > { %1883 = vmatprep.subr.bf16.mxu1 %v2311_v63  ;;  %v1894_v41 = vpack.c.bf16 %v973_v35, %v972_v61 }
 0x19d   : > { %1798 = vmatmul.mubr.msk.f32.vlgmr.msra.gmra.mrb[10].mxu0 %vm1017_vm5, %v2371_v56 }
 0x19e   : > { %1889 = vmatpush1.bf16.msra.mxu0 %v2253_v60  ;;  %1369 = vmatprep.mubr.f32.mxu0 %v2069_v16  ;;  %v975_v60 = vsel %vm961_vm7, %v2019_v29, %v2009_v25 }
 0x19f   : > { %1891 = vmatprep.subr.bf16.mxu0 %v2279_v15  ;;  %1885 = vmatpush1.bf16.msra.mxu1 %v2307_v52  ;;  %v2023_v15 = vunpack.i.l.bf16 %v2022_v28  ;;  %v1896_v47 = vpack.c.bf16 %v975_v60, %v974_v40 }
 0x1a0   : > { %1899 = vmatprep.subr.bf16.mxu1 %v2266_v1 }
 0x1a1   : > { %v968_v1 = vsel %vm961_vm7, %v2023_v15, %v2028_v39  ;;  %v970_v2 = vsel %vm961_vm7, %v2013_v24, %v2023_v15 }
 0x1a2   : > { %1893 = vmatpush1.bf16.msra.mxu0 %v2274_v11  ;;  %1799 = vmatmul.mubr.msk.f32.vlgmr.msra.gmra.mrb[10].mxu1 %vm1017_vm5, %v2371_v56  ;;  %v2039_v11 = vunpack.i.h.bf16 %v2037_v44  ;;  %v1906_v4 = vpack.c.bf16 %v969_v50, %v968_v1  ;;  %v1909_v6 = vpack.c.bf16 %v971_v3, %v970_v2 }
 0x1a3   : > { %1895 = vmatprep.subr.bf16.mxu0 %v1894_v41  ;;  %1901 = vmatpush1.bf16.msra.mxu1 %v2262_v0  ;;  %v735_v0 = vadd.s32 896, %v2330_v58 }
 0x1a4   : > { %1440 = vmatprep.mubr.f32.mxu1 %v2069_v16  ;;  %1903 = vmatprep.subr.bf16.mxu1 %v2282_v19  ;;  %v2033_v19 = vunpack.i.l.bf16 %v2032_v43 }
 0x1a5   : > { %v789_v8 = vand.u32 511, %v735_v0 }
 0x1a6   : > { %1897 = vmatpush1.bf16.msra.mxu0 %v1896_v47  ;;  %v964_v7 = vsel %vm961_vm7, %v2033_v19, %v2038_v62 }
 0x1a7   : > { %1912 = vmatprep.subr.bf16.mxu0 %v2292_v33  ;;  %1905 = vmatpush1.bf16.msra.mxu1 %v2277_v14  ;;  %v965_v33 = vsel %vm961_vm7, %v2034_v5, %v2039_v11  ;;  %v2044_v14 = vunpack.i.h.bf16 %v2042_v46  ;;  %vm1819_vm10 = vcmp.ne.s32.totalorder %v789_v8, 511 }
 0x1a8   : > { %1908 = vmatprep.subr.msk.bf16.mxu1 %vm1907_vm9, %v1906_v4  ;;  %v1919_v12 = vpack.c.bf16 %v965_v33, %v964_v7  ;;  %vm1932_vm11 = vmpackc.low %vm1819_vm10, %vm1819_vm10 }
 0x1a9   : > { %1800 = vmatmul.mubr.msk.f32.vlgmr.msra.gmra.mrb[12].mxu0 %vm1017_vm5, %v2371_v56  ;;  %v977_v53 = vsel %vm961_vm7, %v2044_v14, %v2019_v29 }
 0x1aa   : > { %1914 = vmatpush1.bf16.msra.mxu0 %v2288_v30  ;;  %1511 = vmatprep.mubr.f32.mxu0 %v2069_v16  ;;  %v966_v30 = vsel %vm961_vm7, %v2028_v39, %v2033_v19 }
 0x1ab   : > { %1916 = vmatprep.subr.bf16.mxu0 %v2309_v55  ;;  %1910 = vmatpush1.bf16.msra.mxu1 %v1909_v6  ;;  %v1921_v55 = vpack.c.bf16 %v967_v10, %v966_v30 }
 0x1ac   : > { %1924 = vmatprep.subr.bf16.mxu1 %v2295_v36  ;;  %v1931_v36 = vpack.c.bf16 %v977_v53, %v976_v54 }
 0x1ae   : > { %1918 = vmatpush1.bf16.msra.mxu0 %v2304_v48  ;;  %1805 = vmatmul.mubr.msk.f32.vlgmr.msra.gmra.mrb[12].mxu1 %vm1017_vm5, %v2371_v56  ;;  %v963_v48 = vsel %vm961_vm7, %v2039_v11, %v2044_v14 }
 0x1af   : > { %1920 = vmatprep.subr.bf16.mxu0 %v1919_v12  ;;  %1926 = vmatpush1.bf16.msra.mxu1 %v2290_v32  ;;  %v1934_v32 = vpack.c.bf16 %v963_v48, %v962_v57 }
 0x1b0   : > { %1582 = vmatprep.mubr.f32.mxu1 %v2069_v16  ;;  %1928 = vmatprep.subr.bf16.mxu1 %v2311_v63  ;;  %v2487_v16 = vpop.permute.xlu0 %1014 }
 0x1b2   : > { %1922 = vmatpush1.bf16.msra.mxu0 %v1921_v55 }
 0x1b3   : > { %1930 = vmatpush1.bf16.msra.mxu1 %v2307_v52 }
 0x1b4   : > { %1933 = vmatprep.subr.msk.bf16.mxu1 %vm1932_vm11, %v1931_v36 }
 0x1b5   : > { %1806 = vmatmul.mubr.msk.f32.vlgmr.msra.gmra.mrb[14].mxu0 %vm1017_vm5, %v2371_v56 }
 0x1b7   : > { %1935 = vmatpush1.bf16.msra.mxu1 %v1934_v32 }
 0x1ba   : > { %1811 = vmatmul.mubr.msk.f32.vlgmr.msra.gmra.mrb[14].mxu1 %vm1017_vm5, %v2371_v56 }
 0x264   : > { %v1087_v52 = vpop.f32.mrb[8].mxu0 }
 0x265   : > { %v1088_v63 = vadd.f32 %v1087_v52, %v2487_v16  ;;  %v1089_v58 = vpop.f32.mrb[9].mxu0 }
 0x266   : > { %v1090_v49 = vadd.f32 %v1089_v58, %v2487_v16 }
 0x267   : > { %1589 = vst [vmem:[%s2494_s21] sm:$0xff] %v1088_v63  ;;  %v1622_v56 = vmul.f32 %v1088_v63, %v1088_v63 }
 0x268   : > { %1590 = vst [vmem:[%s2494_s21 + $0x8] sm:$0xff] %v1090_v49  ;;  %v1605_v51 = vadd.f32 %v1090_v49, %v1088_v63  ;;  %v1623_v59 = vmul.f32 %v1090_v49, %v1090_v49 }
 0x269   : > { %v1158_v17 = vpop.f32.mrb[8].mxu1 }
 0x26a   : > { %v1638_v13 = vadd.f32 %v1623_v59, %v1622_v56  ;;  %v1159_v18 = vadd.f32 %v1158_v17, %v2487_v16  ;;  %v1160_v20 = vpop.f32.mrb[9].mxu1 }
 0x26b   : > { %v1161_v21 = vadd.f32 %v1160_v20, %v2487_v16 }
 0x26c   : > { %1591 = vst [vmem:[%s2494_s21 + $0x10] sm:$0xff] %v1159_v18  ;;  %v1606_v22 = vadd.f32 %v1605_v51, %v1159_v18  ;;  %v1624_v23 = vmul.f32 %v1159_v18, %v1159_v18 }
 0x26d   : > { %1592 = vst [vmem:[%s2494_s21 + $0x18] sm:$0xff] %v1161_v21  ;;  %v1625_v24 = vmul.f32 %v1161_v21, %v1161_v21 }
 0x26e   : > { %v1639_v25 = vadd.f32 %v1638_v13, %v1624_v23  ;;  %v1607_v26 = vadd.f32 %v1606_v22, %v1161_v21 }
 0x270   : > { %v1229_v27 = vpop.f32.mrb[10].mxu0  ;;  %v1640_v28 = vadd.f32 %v1639_v25, %v1625_v24 }
 0x271   : > { %v1230_v29 = vadd.f32 %v1229_v27, %v2487_v16  ;;  %v1231_v31 = vpop.f32.mrb[11].mxu0 }
 0x272   : > { %v1232_v34 = vadd.f32 %v1231_v31, %v2487_v16 }
 0x273   : > { %1593 = vst [vmem:[%s2494_s21 + $0x20] sm:$0xff] %v1230_v29  ;;  %v1608_v61 = vadd.f32 %v1607_v26, %v1230_v29  ;;  %v1626_v35 = vmul.f32 %v1230_v29, %v1230_v29 }
 0x274   : > { %1594 = vst [vmem:[%s2494_s21 + $0x28] sm:$0xff] %v1232_v34  ;;  %v1627_v37 = vmul.f32 %v1232_v34, %v1232_v34 }
 0x275   : > { %v1641_v38 = vadd.f32 %v1640_v28, %v1626_v35  ;;  %v1609_v39 = vadd.f32 %v1608_v61, %v1232_v34  ;;  %v1300_v60 = vpop.f32.mrb[10].mxu1 }
 0x276   : > { %v1301_v41 = vadd.f32 %v1300_v60, %v2487_v16  ;;  %v1302_v42 = vpop.f32.mrb[11].mxu1 }
 0x277   : > { %v1642_v40 = vadd.f32 %v1641_v38, %v1627_v37  ;;  %v1303_v15 = vadd.f32 %v1302_v42, %v2487_v16 }
 0x278   : > { %1595 = vst [vmem:[%s2494_s21 + $0x30] sm:$0xff] %v1301_v41  ;;  %v1610_v43 = vadd.f32 %v1609_v39, %v1301_v41  ;;  %v1628_v44 = vmul.f32 %v1301_v41, %v1301_v41 }
 0x279   : > { %1596 = vst [vmem:[%s2494_s21 + $0x38] sm:$0xff] %v1303_v15  ;;  %v1629_v45 = vmul.f32 %v1303_v15, %v1303_v15 }
 0x27a   : > { %v1643_v47 = vadd.f32 %v1642_v40, %v1628_v44  ;;  %v1611_v50 = vadd.f32 %v1610_v43, %v1303_v15 }
 0x27c   : > { %v1371_v1 = vpop.f32.mrb[12].mxu0  ;;  %v1644_v11 = vadd.f32 %v1643_v47, %v1629_v45 }
 0x27d   : > { %v1372_v62 = vadd.f32 %v1371_v1, %v2487_v16  ;;  %v1373_v2 = vpop.f32.mrb[13].mxu0 }
 0x27e   : > { %v1374_v3 = vadd.f32 %v1373_v2, %v2487_v16 }
 0x27f   : > { %1597 = vst [vmem:[%s2494_s21 + $0x40] sm:$0xff] %v1372_v62  ;;  %v1612_v4 = vadd.f32 %v1611_v50, %v1372_v62  ;;  %v1630_v0 = vmul.f32 %v1372_v62, %v1372_v62 }
 0x280   : > { %1598 = vst [vmem:[%s2494_s21 + $0x48] sm:$0xff] %v1374_v3  ;;  %v1631_v5 = vmul.f32 %v1374_v3, %v1374_v3 }
 0x281   : > { %v1645_v19 = vadd.f32 %v1644_v11, %v1630_v0  ;;  %v1613_v46 = vadd.f32 %v1612_v4, %v1374_v3  ;;  %v1442_v6 = vpop.f32.mrb[12].mxu1 }
 0x282   : > { %v1443_v33 = vadd.f32 %v1442_v6, %v2487_v16  ;;  %v1444_v8 = vpop.f32.mrb[13].mxu1 }
 0x283   : > { %v1646_v7 = vadd.f32 %v1645_v19, %v1631_v5  ;;  %v1445_v14 = vadd.f32 %v1444_v8, %v2487_v16 }
 0x284   : > { %1599 = vst [vmem:[%s2494_s21 + $0x50] sm:$0xff] %v1443_v33  ;;  %v1614_v9 = vadd.f32 %v1613_v46, %v1443_v33  ;;  %v1632_v10 = vmul.f32 %v1443_v33, %v1443_v33 }
 0x285   : > { %1600 = vst [vmem:[%s2494_s21 + $0x58] sm:$0xff] %v1445_v14  ;;  %v1633_v30 = vmul.f32 %v1445_v14, %v1445_v14 }
 0x286   : > { %v1647_v12 = vadd.f32 %v1646_v7, %v1632_v10  ;;  %v1615_v55 = vadd.f32 %v1614_v9, %v1445_v14 }
 0x288   : > { %v1513_v54 = vpop.f32.mrb[14].mxu0  ;;  %v1648_v53 = vadd.f32 %v1647_v12, %v1633_v30 }
 0x289   : > { %v1514_v36 = vadd.f32 %v1513_v54, %v2487_v16  ;;  %v1515_v48 = vpop.f32.mrb[15].mxu0 }
 0x28a   : > { %v1516_v57 = vadd.f32 %v1515_v48, %v2487_v16 }
 0x28b   : > { %1601 = vst [vmem:[%s2494_s21 + $0x60] sm:$0xff] %v1514_v36  ;;  %v1616_v32 = vadd.f32 %v1615_v55, %v1514_v36  ;;  %v1634_v52 = vmul.f32 %v1514_v36, %v1514_v36 }
 0x28c   : > { %1602 = vst [vmem:[%s2494_s21 + $0x68] sm:$0xff] %v1516_v57  ;;  %v1635_v63 = vmul.f32 %v1516_v57, %v1516_v57 }
 0x28d   : > { %v1649_v58 = vadd.f32 %v1648_v53, %v1634_v52  ;;  %v1617_v49 = vadd.f32 %v1616_v32, %v1516_v57  ;;  %v1584_v56 = vpop.f32.mrb[14].mxu1 }
 0x28e   : > { %v1585_v51 = vadd.f32 %v1584_v56, %v2487_v16  ;;  %v1586_v59 = vpop.f32.mrb[15].mxu1 }
 0x28f   : > { %v1650_v13 = vadd.f32 %v1649_v58, %v1635_v63  ;;  %v1587_v17 = vadd.f32 %v1586_v59, %v2487_v16 }
 0x290   : > { %1603 = vst [vmem:[%s2494_s21 + $0x70] sm:$0xff] %v1585_v51  ;;  %v1636_v18 = vmul.f32 %v1585_v51, %v1585_v51  ;;  %v1618_v20 = vadd.f32 %v1617_v49, %v1585_v51 }
 0x291   : > { %1604 = vst [vmem:[%s2494_s21 + $0x78] sm:$0xff] %v1587_v17  ;;  %v1637_v21 = vmul.f32 %v1587_v17, %v1587_v17 }
 0x292   : > { %v1619_v22 = vadd.f32 %v1618_v20, %v1587_v17  ;;  %v1651_v23 = vadd.f32 %v1650_v13, %v1636_v18 }
 0x294   : > { %1620 = vadd.xlane.f32.xlu1 %v1619_v22  ;;  %v1652_v24 = vadd.f32 %v1651_v23, %v1637_v21 }
 0x296   : > { %1653 = vadd.xlane.f32.xlu0 %v1652_v24 }
 0x321   : > { %v1621_v25 = vpop.xlane.xlu1 %1620 }
 0x322   : > { %1656 = vst.msk [vmem:[%s365_s26] sm:$0xff] %vm1655_vm12, %v1621_v25 }
 0x323   : > { %v1654_v16 = vpop.xlane.xlu0 %1653 }
 0x324   : > { %1657 = vst.msk [vmem:[%s365_s26 + $0x8] sm:$0xff] %vm1655_vm12, %v1654_v16 }
 0x325 PF: > { %p15_p10 = scmp.ge.s32.totalorder %s2132_s28, 4   ;;  %s2555_s24 = smov %s2063_s25 }
 0x326   : > { %s2556_s25 = smov %s2141_s8  ;;  %s2557_s26 = smov %s2132_s28 }
 0x327   :  { %17 = sbr.rel (!%p15_p10) target bundleno = 2 (0x2), region = 117 }

// kernel: decoder_block_pallas.3
= control target key start
LH: loop header
LB: loop body
LE: loop exit
PB: predicated region body
PF: predicated region fallthrough
CT: control target
= control target key end

     0   :  { %s1446_s21 = smov 0   ;;  %s1741_s0 = inlined_call_operand.vmem [shape: f32[8,4096], index: 0, kind: input, shape index: {}]   ;;  %s1742_s1 = inlined_call_operand.vmem [shape: f32[8,1], index: 1, kind: input, shape index: {}]   ;;  %s1743_s2 = inlined_call_operand.vmem [shape: f32[8,1], index: 2, kind: input, shape index: {}]   ;;  %s1744_s3 = inlined_call_operand.vmem [shape: f32[8,24], index: 3, kind: input, shape index: {}]   ;;  %s1745_s4 = inlined_call_operand.vmem [shape: f32[8,1], index: 4, kind: input, shape index: {}]   ;;  %s1746_s5 = inlined_call_operand.vmem [shape: f32[8,4096], index: 5, kind: output, shape index: {0}]   ;;  %s1747_s6 = inlined_call_operand.vmem [shape: f32[2,16,1], index: 6, kind: output, shape index: {1}]  }
   0x1 LB: > { %s1452_s22 = sadd.s32 4294967295, %s1404_s21   ;;  %p1304_p0 = scmp.ge.s32.totalorder %s1404_s21, 1  ;;  %s1404_s21 = sphi %s1446_s21, %s17_s21  }
   0x2   : > { %p216_p1 = scmp.lt.s32.totalorder %s1404_s21, 3 }
   0x4   : > { %p217_p2 = pnand %p1304_p0, %p216_p1 }
   0x5   : > { %v268_v0 = vld [vmem:[%s1742_s1] sm:$0xff] (!%p217_p2)  ;;  %v1406_v1 = vmov (!%p217_p2), 0   ;;  %s1305_s27 = sshll.u32 (!%p217_p2), %s1452_s22, 4  ;;  %s1407_s8 = smov (!%p217_p2), 1   ;;  %v1408_v49 = vmov (!%p217_p2), 0.0   ;;  %vm1410_vm2 = vmmov (!%p217_p2), 1  }
   0x6   : > { %220 = sbr.rel (%p217_p2) target bundleno = 664 (0x298), region = 40  ;;  %1381 = vset.pattern.permute.xlu0 (!%p217_p2), %v1406_v1  ;;  %1397 = vset.pattern.permute.xlu1 (!%p217_p2), %v1406_v1  ;;  %v306_v2 = vld [vmem:[%s1743_s2] sm:$0xff] (!%p217_p2)  ;;  %p252_p3 = scmp.lt.s32.totalorder (!%p217_p2), %s1305_s27, 31  ;;  %vm570_vm5 = vcmask (!%p217_p2), 195584   ;;  %vm1208_vm10 = vcmask (!%p217_p2), 7168  }
   0x7   : > { %287 = vperm.xlu0 (!%p217_p2), %1381, %v268_v0   ;;  %638 = vmatprep.mubr.f32.mxu0 (!%p217_p2), %v1408_v49  ;;  %s1409_s9 = smov (!%p217_p2), 127   ;;  %p263_p4 = scmp.lt.s32.totalorder (!%p217_p2), %s1452_s22, 1 }
   0x8   : > { %709 = vmatprep.mubr.f32.mxu1 (!%p217_p2), %v1408_v49 }
   0xb   : > { %309 = vperm.xlu0 (!%p217_p2), %1381, %v306_v2  }
   0xd   : > { %s1749_s27 = smov (!%p252_p3, %s1305_s27), 31  ;;  %s1751_s22 = smov (!%p263_p4, %s1452_s22), 1 }
   0xe   : > { %s1306_s28 = sshll.u32 %s1749_s27, 3  ;;  %s1329_s17 = sshll.u32 %s1751_s22, 4 }
   0xf   : > { %s1471_s7 = scalar_lea.vmem %s1741_s0, %s1306_s28  ;;  %s1699_s16 = scalar_lea.vmem %s1746_s5, %s1306_s28 }
  0x10   : > { %v280_v4 = vld [vmem:[%s1471_s7 + $0x58] sm:$0xff]  ;;  %v277_v5 = vld [vmem:[%s1471_s7 + $0x40] sm:$0xff]  ;;  %v278_v6 = vld [vmem:[%s1471_s7 + $0x48] sm:$0xff]  ;;  %s267_s20 = scalar_lea.vmem %s1747_s6, %s1329_s17 }
  0x11   : > { %v279_v7 = vld [vmem:[%s1471_s7 + $0x50] sm:$0xff]  ;;  %v284_v8 = vld [vmem:[%s1471_s7 + $0x78] sm:$0xff]  ;;  %v281_v13 = vld [vmem:[%s1471_s7 + $0x60] sm:$0xff] }
  0x12   : > { %v283_v9 = vld [vmem:[%s1471_s7 + $0x70] sm:$0xff]  ;;  %v282_v14 = vld [vmem:[%s1471_s7 + $0x68] sm:$0xff]  ;;  %v272_v37 = vld [vmem:[%s1471_s7 + $0x18] sm:$0xff] }
  0x13   : > { %v271_v22 = vld [vmem:[%s1471_s7 + $0x10] sm:$0xff]  ;;  %v270_v40 = vld [vmem:[%s1471_s7 + $0x8] sm:$0xff]  ;;  %v269_v50 = vld [vmem:[%s1471_s7] sm:$0xff] }
  0x14   : > { %v274_v45 = vld [vmem:[%s1471_s7 + $0x28] sm:$0xff]  ;;  %v276_v54 = vld [vmem:[%s1471_s7 + $0x38] sm:$0xff]  ;;  %v273_v58 = vld [vmem:[%s1471_s7 + $0x20] sm:$0xff] }
  0x15   : > { %v275_v1 = vld [vmem:[%s1471_s7 + $0x30] sm:$0xff] }
  0x86   : > { %v1473_v3 = vpop.permute.xlu0 %287 }
  0x87   : > { %v301_v10 = vmul.f32 %v1473_v3, %v280_v4  ;;  %v298_v11 = vmul.f32 %v1473_v3, %v277_v5  ;;  %v299_v12 = vmul.f32 %v1473_v3, %v278_v6  ;;  %v300_v16 = vmul.f32 %v1473_v3, %v279_v7 }
  0x88   : > { %v305_v17 = vmul.f32 %v1473_v3, %v284_v8  ;;  %v304_v21 = vmul.f32 %v1473_v3, %v283_v9  ;;  %v302_v25 = vmul.f32 %v1473_v3, %v281_v13  ;;  %v303_v26 = vmul.f32 %v1473_v3, %v282_v14 }
  0x89   : > { %v292_v31 = vmul.f32 %v1473_v3, %v271_v22  ;;  %v293_v44 = vmul.f32 %v1473_v3, %v272_v37  ;;  %v291_v48 = vmul.f32 %v1473_v3, %v270_v40  ;;  %v295_v53 = vmul.f32 %v1473_v3, %v274_v45  ;;  %v1616_v45 = vld [vmem:[%s1744_s3] sm:$0xff] }
  0x8a   : > { %v1486_v15 = vpop.permute.xlu0 %309  ;;  %v290_v57 = vmul.f32 %v1473_v3, %v269_v50  ;;  %v297_v61 = vmul.f32 %v1473_v3, %v276_v54  ;;  %v294_v0 = vmul.f32 %v1473_v3, %v273_v58  ;;  %v296_v6 = vmul.f32 %v1473_v3, %v275_v1 }
  0x8b   : > { %v323_v18 = vadd.f32 %v1486_v15, %v301_v10  ;;  %v320_v19 = vadd.f32 %v1486_v15, %v298_v11  ;;  %v321_v20 = vadd.f32 %v1486_v15, %v299_v12  ;;  %v322_v23 = vadd.f32 %v1486_v15, %v300_v16  ;;  %v564_v10 = vld [vmem:[%s1745_s4] sm:$0xff] }
  0x8c   : > { %v327_v24 = vadd.f32 %v1486_v15, %v305_v17  ;;  %v326_v30 = vadd.f32 %v1486_v15, %v304_v21  ;;  %v324_v32 = vadd.f32 %v1486_v15, %v302_v25  ;;  %v325_v36 = vadd.f32 %v1486_v15, %v303_v26 }
  0x8d   : > { %v1499_v27 = vmax.f32 %v323_v18, 0.0  ;;  %v1501_v28 = vmax.f32 %v320_v19, 0.0  ;;  %v1503_v29 = vmax.f32 %v321_v20, 0.0  ;;  %v1512_v34 = vmax.f32 %v322_v23, 0.0 }
  0x8e   : > { %v1514_v35 = vmax.f32 %v327_v24, 0.0  ;;  %v1519_v38 = vmax.f32 %v326_v30, 0.0  ;;  %v314_v39 = vadd.f32 %v1486_v15, %v292_v31  ;;  %v1527_v42 = vmax.f32 %v324_v32, 0.0 }
  0x8f   : > { %471 = vrot.lane.b32.xlu0 %v1499_v27, %s1407_s8  ;;  %v1382_v33 = vpack.i.bf16 %v1503_v29, %v1501_v28  ;;  %v1529_v43 = vmax.f32 %v325_v36, 0.0  ;;  %v315_v47 = vadd.f32 %v1486_v15, %v293_v44  ;;  %v313_v52 = vadd.f32 %v1486_v15, %v291_v48 }
  0x90   : > { %v1387_v41 = vpack.i.bf16 %v1512_v34, %v1514_v35  ;;  %v1534_v46 = vmax.f32 %v314_v39, 0.0  ;;  %v317_v56 = vadd.f32 %v1486_v15, %v295_v53  ;;  %v312_v60 = vadd.f32 %v1486_v15, %v290_v57 }
  0x91   : > { %1383 = vrot.lane.b32.xlu1 %v1382_v33, %s1407_s8  ;;  %v1392_v51 = vpack.i.bf16 %v1529_v43, %v1527_v42  ;;  %v1549_v55 = vmax.f32 %v315_v47, 0.0  ;;  %v1556_v59 = vmax.f32 %v313_v52, 0.0  ;;  %v319_v63 = vadd.f32 %v1486_v15, %v297_v61 }
  0x92   : > { %v1562_v62 = vmax.f32 %v317_v56, 0.0  ;;  %v1569_v2 = vmax.f32 %v312_v60, 0.0  ;;  %v316_v4 = vadd.f32 %v1486_v15, %v294_v0  ;;  %v318_v8 = vadd.f32 %v1486_v15, %v296_v6 }
  0x93   : > { %477 = vrot.lane.b32.xlu0 %v1519_v38, %s1407_s8  ;;  %v1574_v5 = vmax.f32 %v319_v63, 0.0  ;;  %v344_v3 = vlaneseq  ;;  %v1352_v61 = vpack.c.bf16 %v1503_v29, %v1556_v59  ;;  %v1356_v1 = vpack.c.bf16 %v1499_v27, %v1549_v55 }
  0x94   : > { %v1579_v7 = vmax.f32 %v316_v4, 0.0  ;;  %v1584_v9 = vmax.f32 %v318_v8, 0.0  ;;  %v1354_v0 = vpack.c.bf16 %v1501_v28, %v1569_v2 }
  0x95   : > { %1388 = vrot.lane.b32.xlu1 %v1387_v41, %s1407_s8  ;;  %v1591_v11 = vand.u32 127, %v344_v3  ;;  %v1364_v3 = vpack.c.bf16 %v1514_v35, %v1574_v5 }
  0x97   : > { %518 = vrot.lane.b32.xlu0 %v1534_v46, %s1409_s9  ;;  %vm481_vm0 = vcmp.lt.s32.totalorder %v1591_v11, 1  ;;  %v357_v14 = vand.u32 511, %v1591_v11  ;;  %v349_v18 = vadd.s32 512, %v1591_v11  ;;  %v348_v54 = vadd.s32 384, %v1591_v11 }
  0x98   : > { %v352_v4 = vadd.s32 896, %v1591_v11  ;;  %vm530_vm7 = vcmp.lt.s32.totalorder %v1591_v11, 127 }
  0x99   : > { %1393 = vrot.lane.b32.xlu1 %v1392_v51, %s1407_s8  ;;  %vm1330_vm1 = vcmp.ne.s32.totalorder %v357_v14, 0  ;;  %v385_v25 = vand.u32 511, %v349_v18  ;;  %v378_v60 = vand.u32 511, %v348_v54 }
  0x9a   : > { %vm1337_vm3 = vmpackc.low %vm1410_vm2, %vm1330_vm1 }
  0x9b   : > { %520 = vrot.lane.b32.xlu0 %v1549_v55, %s1409_s9  ;;  %vm1331_vm4 = vcmp.ne.s32.totalorder %v385_v25, 0  ;;  %vm1332_vm8 = vcmp.ne.s32.totalorder %v378_v60, 511 }
  0x9c   : > { %vm1346_vm6 = vmpackc.low %vm1410_vm2, %vm1331_vm4 }
  0x9d   : > { %516 = vrot.lane.b32.xlu1 %v1556_v59, %s1409_s9 }
  0x9f   : > { %524 = vrot.lane.b32.xlu0 %v1562_v62, %s1409_s9 }
  0xa1   : > { %514 = vrot.lane.b32.xlu1 %v1569_v2, %s1409_s9 }
  0xa3   : > { %528 = vrot.lane.b32.xlu0 %v1574_v5, %s1409_s9 }
  0xa5   : > { %522 = vrot.lane.b32.xlu1 %v1579_v7, %s1409_s9 }
  0xa9   : > { %526 = vrot.lane.b32.xlu1 %v1584_v9, %s1409_s9 }
  0xad   : > { %567 = vperm.xlu1 %1397, %v564_v10   ;;  %v1362_v10 = vpack.c.bf16 %v1527_v42, %v1579_v7 }
 0x101   : > { %v472_v12 = vpop.permute.xlu0 %471 }
 0x103   : > { %v1384_v13 = vpop.permute.xlu1 %1383 }
 0x104   : > { %v1386_v15 = vunpack.i.h.bf16 %v1384_v13  ;;  %v1385_v16 = vunpack.i.l.bf16 %v1384_v13 }
 0x105   : > { %v478_v21 = vpop.permute.xlu0 %477 }
 0x106   : > { %v488_v17 = vsel %vm481_vm0, %v1385_v16, %v1386_v15 }
 0x107   : > { %v1389_v19 = vpop.permute.xlu1 %1388  ;;  %v1334_v20 = vpack.c.bf16 %v1556_v59, %v488_v17 }
 0x108   : > { %v1391_v22 = vunpack.i.h.bf16 %v1389_v19  ;;  %v1390_v23 = vunpack.i.l.bf16 %v1389_v19 }
 0x109   : > { %1335 = vmatprep.subr.bf16.mxu0 %v1334_v20  ;;  %v519_v40 = vpop.permute.xlu0 %518 }
 0x10a   : > { %v486_v24 = vsel %vm481_vm0, %v1391_v22, %v472_v12  ;;  %v489_v26 = vsel %vm481_vm0, %v1390_v23, %v1385_v16  ;;  %v487_v30 = vsel %vm481_vm0, %v1386_v15, %v1391_v22  ;;  %v482_v48 = vsel %vm481_vm0, %v478_v21, %v1390_v23 }
 0x10b   : > { %v1394_v31 = vpop.permute.xlu1 %1393  ;;  %v1339_v32 = vpack.c.bf16 %v1549_v55, %v486_v24  ;;  %v1336_v33 = vpack.c.bf16 %v1569_v2, %v489_v26  ;;  %v1341_v36 = vpack.c.bf16 %v1534_v46, %v487_v30  ;;  %v1348_v53 = vpack.c.bf16 %v1574_v5, %v482_v48 }
 0x10c   : > { %v1396_v37 = vunpack.i.h.bf16 %v1394_v31  ;;  %v1395_v39 = vunpack.i.l.bf16 %v1394_v31  ;;  %v406_v55 = vand.u32 511, %v352_v4  ;;  %v1360_v2 = vpack.c.bf16 %v1529_v43, %v1562_v62 }
 0x10d   : > { %1340 = vmatprep.subr.bf16.mxu1 %v1339_v32  ;;  %1338 = vmatpush1.bf16.msk.msra.mxu0 %vm1337_vm3, %v1336_v33  ;;  %v521_v58 = vpop.permute.xlu0 %520 }
 0x10e   : > { %578 = vmatprep.subr.mxu0 %v1503_v29  ;;  %1342 = vmatpush1.bf16.msra.mxu1 %v1341_v36  ;;  %v485_v41 = vsel %vm481_vm0, %v472_v12, %v1395_v39  ;;  %v484_v47 = vsel %vm481_vm0, %v1395_v39, %v1396_v37  ;;  %v483_v50 = vsel %vm481_vm0, %v1396_v37, %v478_v21  ;;  %vm1333_vm9 = vcmp.ne.s32.totalorder %v406_v55, 511 }
 0x10f   : > { %649 = vmatprep.subr.mxu1 %v1499_v27  ;;  %v517_v44 = vpop.permute.xlu1 %516  ;;  %v1343_v51 = vpack.c.bf16 %v1562_v62, %v484_v47  ;;  %v1345_v52 = vpack.c.bf16 %v1579_v7, %v485_v41  ;;  %v1350_v56 = vpack.c.bf16 %v1584_v9, %v483_v50  ;;  %v1358_v29 = vpack.c.bf16 %v1512_v34, %v1534_v46 }
 0x110   : > { %v1366_v12 = vpack.c.bf16 %v1519_v38, %v1584_v9 }
 0x111   : > { %579 = vmatpush1.msra.mxu0 %v1501_v28  ;;  %v525_v6 = vpop.permute.xlu0 %524  ;;  %v536_v28 = vsel %vm530_vm7, %v517_v44, %v519_v40 }
 0x112   : > { %1313 = vmatmul.mubr.msk.f32.vlgmr.msra.gmra.mrb[0].mxu0 %vm570_vm5, %v1616_v45  ;;  %650 = vmatpush1.msra.mxu1 %v1512_v34  ;;  %v535_v34 = vsel %vm530_vm7, %v519_v40, %v521_v58 }
 0x113   : > { %1344 = vmatprep.subr.bf16.mxu0 %v1343_v51  ;;  %1314 = vmatmul.mubr.msk.f32.vlgmr.msra.gmra.mrb[0].mxu1 %vm570_vm5, %v1616_v45  ;;  %v515_v57 = vpop.permute.xlu1 %514 }
 0x114   : > { %1349 = vmatprep.subr.bf16.mxu1 %v1348_v53  ;;  %1347 = vmatpush1.bf16.msk.msra.mxu0 %vm1346_vm6, %v1345_v52  ;;  %v537_v59 = vsel %vm530_vm7, %v515_v57, %v517_v44 }
 0x115   : > { %720 = vmatprep.subr.mxu0 %v1529_v43  ;;  %1351 = vmatpush1.bf16.msra.mxu1 %v1350_v56  ;;  %v529_v8 = vpop.permute.xlu0 %528 }
 0x116   : > { %791 = vmatprep.subr.mxu1 %v1514_v35  ;;  %780 = vmatprep.mubr.f32.mxu0 %v1408_v49 }
 0x117   : > { %851 = vmatprep.mubr.f32.mxu1 %v1408_v49  ;;  %v523_v63 = vpop.permute.xlu1 %522 }
 0x118   : > { %721 = vmatpush1.msra.mxu0 %v1527_v42  ;;  %v534_v27 = vsel %vm530_vm7, %v521_v58, %v523_v63  ;;  %v538_v42 = vsel %vm530_vm7, %v529_v8, %v515_v57  ;;  %v533_v35 = vsel %vm530_vm7, %v523_v63, %v525_v6 }
 0x119   : > { %1317 = vmatmul.mubr.msk.f32.vlgmr.msra.gmra.mrb[2].mxu0 %vm570_vm5, %v1616_v45  ;;  %792 = vmatpush1.msra.mxu1 %v1519_v38 }
 0x11a   : > { %1353 = vmatprep.subr.bf16.mxu0 %v1352_v61  ;;  %1318 = vmatmul.mubr.msk.f32.vlgmr.msra.gmra.mrb[2].mxu1 %vm570_vm5, %v1616_v45 }
 0x11b   : > { %1355 = vmatpush1.bf16.msra.mxu0 %v1354_v0  ;;  %1357 = vmatprep.subr.bf16.mxu1 %v1356_v1  ;;  %v527_v46 = vpop.permute.xlu1 %526 }
 0x11c   : > { %862 = vmatprep.subr.mxu0 %v536_v28  ;;  %1359 = vmatpush1.bf16.msra.mxu1 %v1358_v29  ;;  %v532_v43 = vsel %vm530_vm7, %v525_v6, %v527_v46  ;;  %v531_v38 = vsel %vm530_vm7, %v527_v46, %v529_v8 }
 0x11d   : > { %1321 = vmatprep.subr.msk.mxu1 %vm1332_vm8, %v534_v27  ;;  %922 = vmatprep.mubr.f32.mxu0 %v1408_v49 }
 0x11e   : > { %993 = vmatprep.mubr.f32.mxu1 %v1408_v49 }
 0x11f   : > { %863 = vmatpush1.msra.mxu0 %v537_v59 }
 0x120   : > { %1319 = vmatmul.mubr.msk.f32.vlgmr.msra.gmra.mrb[4].mxu0 %vm570_vm5, %v1616_v45  ;;  %934 = vmatpush1.msra.mxu1 %v535_v34 }
 0x121   : > { %1361 = vmatprep.subr.bf16.mxu0 %v1360_v2  ;;  %1322 = vmatmul.mubr.msk.f32.vlgmr.msra.gmra.mrb[4].mxu1 %vm570_vm5, %v1616_v45 }
 0x122   : > { %1363 = vmatpush1.bf16.msra.mxu0 %v1362_v10  ;;  %1365 = vmatprep.subr.bf16.mxu1 %v1364_v3 }
 0x123   : > { %1004 = vmatprep.subr.mxu0 %v532_v43  ;;  %1367 = vmatpush1.bf16.msra.mxu1 %v1366_v12 }
 0x124   : > { %1325 = vmatprep.subr.msk.mxu1 %vm1333_vm9, %v538_v42  ;;  %1064 = vmatprep.mubr.f32.mxu0 %v1408_v49 }
 0x125   : > { %1135 = vmatprep.mubr.f32.mxu1 %v1408_v49 }
 0x126   : > { %1005 = vmatpush1.msra.mxu0 %v533_v35 }
 0x127   : > { %1323 = vmatmul.mubr.msk.f32.vlgmr.msra.gmra.mrb[6].mxu0 %vm570_vm5, %v1616_v45  ;;  %1076 = vmatpush1.msra.mxu1 %v531_v38 }
 0x128   : > { %1326 = vmatmul.mubr.msk.f32.vlgmr.msra.gmra.mrb[6].mxu1 %vm570_vm5, %v1616_v45 }
 0x12c   : > { %v1692_v62 = vpop.permute.xlu1 %567 }
 0x1e5   : > { %v640_v49 = vpop.f32.mrb[0].mxu0 }
 0x1e6   : > { %v641_v5 = vadd.f32 %v640_v49, %v1692_v62  ;;  %v642_v7 = vpop.f32.mrb[1].mxu0  ;;  %v711_v9 = vpop.f32.mrb[0].mxu1 }
 0x1e7   : > { %v643_v11 = vadd.f32 %v642_v7, %v1692_v62  ;;  %v712_v13 = vadd.f32 %v711_v9, %v1692_v62  ;;  %v713_v14 = vpop.f32.mrb[1].mxu1 }
 0x1e8   : > { %1142 = vst [vmem:[%s1699_s16] sm:$0xff] %v641_v5  ;;  %v1175_v15 = vmul.f32 %v641_v5, %v641_v5  ;;  %v714_v16 = vadd.f32 %v713_v14, %v1692_v62 }
 0x1e9   : > { %1143 = vst [vmem:[%s1699_s16 + $0x8] sm:$0xff] %v643_v11  ;;  %v1158_v17 = vadd.f32 %v643_v11, %v641_v5  ;;  %v1176_v18 = vmul.f32 %v643_v11, %v643_v11  ;;  %1144 = vst [vmem:[%s1699_s16 + $0x10] sm:$0xff] %v712_v13  ;;  %v1177_v21 = vmul.f32 %v712_v13, %v712_v13 }
 0x1ea   : > { %1145 = vst [vmem:[%s1699_s16 + $0x18] sm:$0xff] %v714_v16  ;;  %v1178_v25 = vmul.f32 %v714_v16, %v714_v16 }
 0x1eb   : > { %v1191_v19 = vadd.f32 %v1176_v18, %v1175_v15  ;;  %v1159_v20 = vadd.f32 %v1158_v17, %v712_v13 }
 0x1ec   : > { %v782_v22 = vpop.f32.mrb[2].mxu0 }
 0x1ed   : > { %v1192_v23 = vadd.f32 %v1191_v19, %v1177_v21  ;;  %v1160_v24 = vadd.f32 %v1159_v20, %v714_v16  ;;  %v783_v26 = vadd.f32 %v782_v22, %v1692_v62  ;;  %v784_v30 = vpop.f32.mrb[3].mxu0  ;;  %v853_v31 = vpop.f32.mrb[2].mxu1 }
 0x1ee   : > { %v785_v32 = vadd.f32 %v784_v30, %v1692_v62  ;;  %v854_v33 = vadd.f32 %v853_v31, %v1692_v62  ;;  %v855_v36 = vpop.f32.mrb[3].mxu1 }
 0x1ef   : > { %v1193_v37 = vadd.f32 %v1192_v23, %v1178_v25  ;;  %1146 = vst [vmem:[%s1699_s16 + $0x20] sm:$0xff] %v783_v26  ;;  %v1161_v39 = vadd.f32 %v1160_v24, %v783_v26  ;;  %v1179_v40 = vmul.f32 %v783_v26, %v783_v26  ;;  %v856_v41 = vadd.f32 %v855_v36, %v1692_v62 }
 0x1f0   : > { %1147 = vst [vmem:[%s1699_s16 + $0x28] sm:$0xff] %v785_v32  ;;  %1148 = vst [vmem:[%s1699_s16 + $0x30] sm:$0xff] %v854_v33  ;;  %v1180_v47 = vmul.f32 %v785_v32, %v785_v32  ;;  %v1181_v51 = vmul.f32 %v854_v33, %v854_v33 }
 0x1f1   : > { %v1194_v44 = vadd.f32 %v1193_v37, %v1179_v40  ;;  %v1162_v45 = vadd.f32 %v1161_v39, %v785_v32  ;;  %1149 = vst [vmem:[%s1699_s16 + $0x38] sm:$0xff] %v856_v41  ;;  %v1182_v53 = vmul.f32 %v856_v41, %v856_v41 }
 0x1f3   : > { %v1195_v48 = vadd.f32 %v1194_v44, %v1180_v47  ;;  %v1163_v50 = vadd.f32 %v1162_v45, %v854_v33  ;;  %v924_v52 = vpop.f32.mrb[4].mxu0 }
 0x1f4   : > { %v925_v54 = vadd.f32 %v924_v52, %v1692_v62  ;;  %v926_v56 = vpop.f32.mrb[5].mxu0  ;;  %v995_v57 = vpop.f32.mrb[4].mxu1 }
 0x1f5   : > { %v1196_v58 = vadd.f32 %v1195_v48, %v1181_v51  ;;  %v1164_v60 = vadd.f32 %v1163_v50, %v856_v41  ;;  %v927_v61 = vadd.f32 %v926_v56, %v1692_v62  ;;  %v996_v63 = vadd.f32 %v995_v57, %v1692_v62  ;;  %v997_v0 = vpop.f32.mrb[5].mxu1 }
 0x1f6   : > { %1150 = vst [vmem:[%s1699_s16 + $0x40] sm:$0xff] %v925_v54  ;;  %v998_v1 = vadd.f32 %v997_v0, %v1692_v62  ;;  %v1183_v29 = vmul.f32 %v925_v54, %v925_v54 }
 0x1f7   : > { %v1197_v4 = vadd.f32 %v1196_v58, %v1182_v53  ;;  %v1165_v6 = vadd.f32 %v1164_v60, %v925_v54  ;;  %1151 = vst [vmem:[%s1699_s16 + $0x48] sm:$0xff] %v927_v61  ;;  %1152 = vst [vmem:[%s1699_s16 + $0x50] sm:$0xff] %v996_v63  ;;  %v1184_v55 = vmul.f32 %v927_v61, %v927_v61 }
 0x1f8   : > { %1153 = vst [vmem:[%s1699_s16 + $0x58] sm:$0xff] %v998_v1  ;;  %v1185_v2 = vmul.f32 %v996_v63, %v996_v63  ;;  %v1186_v49 = vmul.f32 %v998_v1, %v998_v1 }
 0x1f9   : > { %v1198_v28 = vadd.f32 %v1197_v4, %v1183_v29  ;;  %v1166_v27 = vadd.f32 %v1165_v6, %v927_v61 }
 0x1fa   : > { %v1066_v59 = vpop.f32.mrb[6].mxu0 }
 0x1fb   : > { %v1199_v34 = vadd.f32 %v1198_v28, %v1184_v55  ;;  %v1167_v46 = vadd.f32 %v1166_v27, %v996_v63  ;;  %v1067_v8 = vadd.f32 %v1066_v59, %v1692_v62  ;;  %v1068_v10 = vpop.f32.mrb[7].mxu0  ;;  %v1137_v3 = vpop.f32.mrb[6].mxu1 }
 0x1fc   : > { %v1069_v12 = vadd.f32 %v1068_v10, %v1692_v62  ;;  %v1138_v43 = vadd.f32 %v1137_v3, %v1692_v62  ;;  %v1139_v42 = vpop.f32.mrb[7].mxu1 }
 0x1fd   : > { %v1200_v35 = vadd.f32 %v1199_v34, %v1185_v2  ;;  %v1168_v38 = vadd.f32 %v1167_v46, %v998_v1  ;;  %1154 = vst [vmem:[%s1699_s16 + $0x60] sm:$0xff] %v1067_v8  ;;  %v1140_v5 = vadd.f32 %v1139_v42, %v1692_v62  ;;  %v1187_v11 = vmul.f32 %v1067_v8, %v1067_v8 }
 0x1fe   : > { %1155 = vst [vmem:[%s1699_s16 + $0x68] sm:$0xff] %v1069_v12  ;;  %1156 = vst [vmem:[%s1699_s16 + $0x70] sm:$0xff] %v1138_v43  ;;  %v1188_v15 = vmul.f32 %v1069_v12, %v1069_v12  ;;  %v1189_v16 = vmul.f32 %v1138_v43, %v1138_v43 }
 0x1ff   : > { %v1201_v7 = vadd.f32 %v1200_v35, %v1186_v49  ;;  %v1169_v9 = vadd.f32 %v1168_v38, %v1067_v8  ;;  %1157 = vst [vmem:[%s1699_s16 + $0x78] sm:$0xff] %v1140_v5  ;;  %v1190_v20 = vmul.f32 %v1140_v5, %v1140_v5 }
 0x201   : > { %v1202_v13 = vadd.f32 %v1201_v7, %v1187_v11  ;;  %v1170_v14 = vadd.f32 %v1169_v9, %v1069_v12 }
 0x203   : > { %v1171_v17 = vadd.f32 %v1170_v14, %v1138_v43  ;;  %v1203_v18 = vadd.f32 %v1202_v13, %v1188_v15 }
 0x205   : > { %v1172_v19 = vadd.f32 %v1171_v17, %v1140_v5  ;;  %v1204_v21 = vadd.f32 %v1203_v18, %v1189_v16 }
 0x207   : > { %1173 = vadd.xlane.f32.xlu0 %v1172_v19  ;;  %v1205_v22 = vadd.f32 %v1204_v21, %v1190_v20 }
 0x209   : > { %1206 = vadd.xlane.f32.xlu1 %v1205_v22 }
 0x294   : > { %v1174_v62 = vpop.xlane.xlu0 %1173 }
 0x295   : > { %1209 = vst.msk [vmem:[%s267_s20] sm:$0xff] %vm1208_vm10, %v1174_v62 }
 0x296   : > { %v1207_v23 = vpop.xlane.xlu1 %1206 }
 0x297   : > { %1210 = vst.msk [vmem:[%s267_s20 + $0x8] sm:$0xff] %vm1208_vm10, %v1207_v23 }
 0x298 PF: > { %s17_s21 = sadd.s32 1, %s1404_s21  }
 0x299   : > { %p14_p5 = scmp.ge.s32.totalorder %s17_s21, 4  }
 0x29b   :  { %16 = sbr.rel (!%p14_p5) target bundleno = 1 (0x1), region = 82 }

</bundles_post_ra>
